<compile_context>
chip_gen: v7x
topology: tpu7x:2x2x1
jax: 0.10.0
libtpu: 0.0.40
codegen_flags: <defaults>
</compile_context>

<pallas_src>
import jax
import jax.numpy as jnp
from jax.experimental import pallas as pl
from jax.experimental.pallas import tpu as pltpu

LATENT, H1, H2, OUT = 100, 256, 512, 784
LATENT_PAD = 128           # lane-aligned K for the first matmul
_TB_CAP = 1024             # rows per grid step (VMEM budget ~18 MB at 1024)


def _round_up(n, m):
    return ((n + m - 1) // m) * m


def _batch_tiling(B):
    """Pick (TB, B_pad): TB % 8 == 0, B_pad % TB == 0, TB <= _TB_CAP, and
    >= 2 grid steps when the batch is large enough (v7x megacore split)."""
    B8 = _round_up(max(B, 1), 8)
    if B8 <= 16:
        return B8, B8
    TB = min(_TB_CAP, _round_up((B8 + 1) // 2, 8))
    B_pad = _round_up(B8, TB)
    return TB, B_pad


def _generator_kernel(x_ref, w1_ref, b1_ref, w2_ref, b2_ref, w3_ref, b3_ref, o_ref):
    # x / weights are bf16 (MXU native); accumulate + elementwise in f32.
    h1 = jnp.dot(x_ref[...], w1_ref[...],
                 preferred_element_type=jnp.float32) + b1_ref[...]
    h1 = jnp.maximum(h1, 0.0)                                   # ReLU (VPU, f32)
    h2 = jnp.dot(h1.astype(jnp.bfloat16), w2_ref[...],
                 preferred_element_type=jnp.float32) + b2_ref[...]
    h2 = jnp.maximum(h2, 0.0)                                   # ReLU (VPU, f32)
    h3 = jnp.dot(h2.astype(jnp.bfloat16), w3_ref[...],
                 preferred_element_type=jnp.float32) + b3_ref[...]
    o_ref[...] = jnp.tanh(h3).astype(o_ref.dtype)               # Tanh (EUP, f32)


def init_params(key):
    """Deterministic init mimicking torch.nn.Linear (uniform +-1/sqrt(fan_in)).

    Weights stored as (in_features, out_features) f32 so the kernel does x @ W.
    Biases stored as (1, out_features) f32.
    """
    dims = [(LATENT, H1), (H1, H2), (H2, OUT)]
    params = []
    for (fan_in, fan_out) in dims:
        key, kw, kb = jax.random.split(key, 3)
        bound = 1.0 / (fan_in ** 0.5)
        w = jax.random.uniform(kw, (fan_in, fan_out), jnp.float32, -bound, bound)
        b = jax.random.uniform(kb, (1, fan_out), jnp.float32, -bound, bound)
        params.extend([w, b])
    return tuple(params)


def prepare_params(params):
    """Pad latent K to 128 and cast weights to bf16 (done once, host side)."""
    w1, b1, w2, b2, w3, b3 = params
    w1p = (jnp.zeros((LATENT_PAD, H1), jnp.float32)
           .at[:LATENT, :].set(w1).astype(jnp.bfloat16))
    w2p = w2.astype(jnp.bfloat16)
    w3p = w3.astype(jnp.bfloat16)                    # (512, 784) — full-dim block
    b1p = b1.reshape(1, H1).astype(jnp.float32)
    b2p = b2.reshape(1, H2).astype(jnp.float32)
    b3p = b3.reshape(1, OUT).astype(jnp.float32)
    return (w1p, b1p, w2p, b2p, w3p, b3p)


def generator_forward(x, prepared_params, out_dtype=jnp.float32):
    """x: (B, 100) float32 -> (B, 1, 28, 28) out_dtype (default float32)."""
    w1, b1, w2, b2, w3, b3 = prepared_params
    B = x.shape[0]

    TB, B_pad = _batch_tiling(B)
    grid = (B_pad // TB,)

    # Pad batch rows / latent columns with zeros and cast to bf16 once here
    # (halves x HBM reads; x feeds the MXU in bf16 anyway).
    xp = (jnp.zeros((B_pad, LATENT_PAD), jnp.float32)
          .at[:B, :LATENT].set(x).astype(jnp.bfloat16))

    def resident_spec(arr):
        # Full-array block, constant index map -> DMA'd once, stays in VMEM.
        return pl.BlockSpec(arr.shape, lambda i: (0, 0))

    weight_bytes = sum(int(a.size) * a.dtype.itemsize
                       for a in (w1, b1, w2, b2, w3, b3))
    out_itemsize = jnp.dtype(out_dtype).itemsize
    cost = pl.CostEstimate(
        flops=2 * B_pad * (LATENT_PAD * H1 + H1 * H2 + H2 * OUT),
        bytes_accessed=(weight_bytes + int(xp.size) * xp.dtype.itemsize
                        + B_pad * OUT * out_itemsize),
        transcendentals=B_pad * OUT,
    )

    out = pl.pallas_call(
        _generator_kernel,
        out_shape=jax.ShapeDtypeStruct((B_pad, OUT), out_dtype),
        grid=grid,
        in_specs=[
            pl.BlockSpec((TB, LATENT_PAD), lambda i: (i, 0)),   # x tile (pipelined)
            resident_spec(w1), resident_spec(b1),
            resident_spec(w2), resident_spec(b2),
            resident_spec(w3), resident_spec(b3),
        ],
        # Last dim 784 equals the full array dim (legal block) -> no 896-wide
        # pad and no wrapper-side depad copy.
        out_specs=pl.BlockSpec((TB, OUT), lambda i: (i, 0)),
        compiler_params=pltpu.CompilerParams(
            dimension_semantics=("parallel",),
            vmem_limit_bytes=48 * 1024 * 1024,
        ),
        cost_estimate=cost,
    )(xp, w1, b1, w2, b2, w3, b3)

    # Drop batch padding (identity when B_pad == B), then torch's
    # .view(-1, 1, 28, 28); (B, 784) -> (B, 1, 28, 28) is a free reshape.
    return out[:B].reshape(-1, 1, 28, 28)


def _reference_forward(x, params):
    """Pure-JAX f32 reference of the torch module (for a tolerance check)."""
    w1, b1, w2, b2, w3, b3 = params
    h = jnp.maximum(x @ w1 + b1, 0.0)
    h = jnp.maximum(h @ w2 + b2, 0.0)
    return jnp.tanh(h @ w3 + b3).reshape(-1, 1, 28, 28)


if __name__ == "__main__":
    key = jax.random.PRNGKey(0)
    key, kx = jax.random.split(key)
    B = 2
    x = jax.random.normal(kx, (B, LATENT), dtype=jnp.float32)   # latent noise

    params = init_params(key)
    prepped = prepare_params(params)

    y = generator_forward(x, prepped)
    y = jax.block_until_ready(y)

    assert y.shape == (B, 1, 28, 28), y.shape
    assert y.dtype == jnp.float32
    # tanh output must be in [-1, 1]
    assert float(jnp.max(jnp.abs(y))) <= 1.0 + 1e-6

    # Loose tolerance vs f32 reference (weights/MXU inputs are bf16).
    y_ref = _reference_forward(x, params)
    assert float(jnp.max(jnp.abs(y - y_ref))) < 5e-2

    print("KERNEL_OK")
</pallas_src>

<mosaic_0001>
module attributes {stable_mosaic.version = 11 : i64} {
  func.func @_generator_kernel(%arg0: i32, %arg1: memref<8x128xbf16, #tpu.memory_space<vmem>>, %arg2: memref<128x256xbf16, #tpu.memory_space<vmem>>, %arg3: memref<1x256xf32, #tpu.memory_space<vmem>>, %arg4: memref<256x512xbf16, #tpu.memory_space<vmem>>, %arg5: memref<1x512xf32, #tpu.memory_space<vmem>>, %arg6: memref<512x784xbf16, #tpu.memory_space<vmem>>, %arg7: memref<1x784xf32, #tpu.memory_space<vmem>>, %arg8: memref<8x784xf32, #tpu.memory_space<vmem>>) attributes {dimension_semantics = [#tpu.dimension_semantics<parallel>], iteration_bounds = array<i64: 1>, scalar_prefetch = 0 : i64, scratch_operands = 0 : i64, tpu.core_type = #tpu.core_type<tc>, window_params = [{transform_indices = @transform_0, window_bounds = array<i64: 8, 128>}, {pipeline_mode = #tpu.pipeline_mode<synchronous>, transform_indices = @transform_1, window_bounds = array<i64: 128, 256>}, {pipeline_mode = #tpu.pipeline_mode<synchronous>, transform_indices = @transform_2, window_bounds = array<i64: 1, 256>}, {pipeline_mode = #tpu.pipeline_mode<synchronous>, transform_indices = @transform_3, window_bounds = array<i64: 256, 512>}, {pipeline_mode = #tpu.pipeline_mode<synchronous>, transform_indices = @transform_4, window_bounds = array<i64: 1, 512>}, {pipeline_mode = #tpu.pipeline_mode<synchronous>, transform_indices = @transform_5, window_bounds = array<i64: 512, 784>}, {pipeline_mode = #tpu.pipeline_mode<synchronous>, transform_indices = @transform_6, window_bounds = array<i64: 1, 784>}, {transform_indices = @transform_7, window_bounds = array<i64: 8, 784>}]} {
    %c0 = arith.constant 0 : index
    %c0_0 = arith.constant 0 : index
    %0 = vector.load %arg1[%c0, %c0_0] : memref<8x128xbf16, #tpu.memory_space<vmem>>, vector<8x128xbf16>
    %c0_1 = arith.constant 0 : index
    %c0_2 = arith.constant 0 : index
    %1 = vector.load %arg2[%c0_1, %c0_2] : memref<128x256xbf16, #tpu.memory_space<vmem>>, vector<128x256xbf16>
    %cst = arith.constant dense<0.000000e+00> : vector<8x256xf32>
    %2 = tpu.matmul %0, %1, %cst {dimension_numbers = #tpu.dot_dimension_numbers<[1], [0], [0], [1], [0, 0, 1, 1], [], []>} : vector<8x128xbf16>, vector<128x256xbf16>, vector<8x256xf32> -> vector<8x256xf32>
    %c0_3 = arith.constant 0 : index
    %c0_4 = arith.constant 0 : index
    %3 = vector.load %arg3[%c0_3, %c0_4] : memref<1x256xf32, #tpu.memory_space<vmem>>, vector<1x256xf32>
    %4 = vector.broadcast %3 : vector<1x256xf32> to vector<8x256xf32>
    %5 = arith.addf %2, %4 : vector<8x256xf32>
    %cst_5 = arith.constant 0.000000e+00 : f32
    %6 = vector.broadcast %cst_5 : f32 to vector<8x256xf32>
    %7 = arith.maximumf %5, %6 : vector<8x256xf32>
    %8 = arith.truncf %7 : vector<8x256xf32> to vector<8x256xbf16>
    %c0_6 = arith.constant 0 : index
    %c0_7 = arith.constant 0 : index
    %9 = vector.load %arg4[%c0_6, %c0_7] : memref<256x512xbf16, #tpu.memory_space<vmem>>, vector<256x512xbf16>
    %cst_8 = arith.constant dense<0.000000e+00> : vector<8x512xf32>
    %10 = tpu.matmul %8, %9, %cst_8 {dimension_numbers = #tpu.dot_dimension_numbers<[1], [0], [0], [1], [0, 0, 1, 1], [], []>} : vector<8x256xbf16>, vector<256x512xbf16>, vector<8x512xf32> -> vector<8x512xf32>
    %c0_9 = arith.constant 0 : index
    %c0_10 = arith.constant 0 : index
    %11 = vector.load %arg5[%c0_9, %c0_10] : memref<1x512xf32, #tpu.memory_space<vmem>>, vector<1x512xf32>
    %12 = vector.broadcast %11 : vector<1x512xf32> to vector<8x512xf32>
    %13 = arith.addf %10, %12 : vector<8x512xf32>
    %cst_11 = arith.constant 0.000000e+00 : f32
    %14 = vector.broadcast %cst_11 : f32 to vector<8x512xf32>
    %15 = arith.maximumf %13, %14 : vector<8x512xf32>
    %16 = arith.truncf %15 : vector<8x512xf32> to vector<8x512xbf16>
    %c0_12 = arith.constant 0 : index
    %c0_13 = arith.constant 0 : index
    %17 = vector.load %arg6[%c0_12, %c0_13] : memref<512x784xbf16, #tpu.memory_space<vmem>>, vector<512x784xbf16>
    %cst_14 = arith.constant dense<0.000000e+00> : vector<8x784xf32>
    %18 = tpu.matmul %16, %17, %cst_14 {dimension_numbers = #tpu.dot_dimension_numbers<[1], [0], [0], [1], [0, 0, 1, 1], [], []>} : vector<8x512xbf16>, vector<512x784xbf16>, vector<8x784xf32> -> vector<8x784xf32>
    %c0_15 = arith.constant 0 : index
    %c0_16 = arith.constant 0 : index
    %19 = vector.load %arg7[%c0_15, %c0_16] : memref<1x784xf32, #tpu.memory_space<vmem>>, vector<1x784xf32>
    %20 = vector.broadcast %19 : vector<1x784xf32> to vector<8x784xf32>
    %21 = arith.addf %18, %20 : vector<8x784xf32>
    %22 = math.tanh %21 : vector<8x784xf32>
    %c0_17 = arith.constant 0 : index
    %c0_18 = arith.constant 0 : index
    %23 = vector.load %arg8[%c0_17, %c0_18] : memref<8x784xf32, #tpu.memory_space<vmem>>, vector<8x784xf32>
    tpu.vector_store %arg8[%c0_17, %c0_18], %22 {strides = array<i32>} : memref<8x784xf32, #tpu.memory_space<vmem>>, vector<8x784xf32>,
    return
  }
  func.func @transform_0(%arg0: i32) -> (i32, i32) {
    %c0_i32 = arith.constant 0 : i32
    %c0_i32_0 = arith.constant 0 : i32
    return %arg0, %c0_i32 : i32, i32
  }
  func.func @transform_1(%arg0: i32) -> (i32, i32) {
    %c0_i32 = arith.constant 0 : i32
    %c0_i32_0 = arith.constant 0 : i32
    %c0_i32_1 = arith.constant 0 : i32
    return %c0_i32, %c0_i32_0 : i32, i32
  }
  func.func @transform_2(%arg0: i32) -> (i32, i32) {
    %c0_i32 = arith.constant 0 : i32
    %c0_i32_0 = arith.constant 0 : i32
    %c0_i32_1 = arith.constant 0 : i32
    return %c0_i32, %c0_i32_0 : i32, i32
  }
  func.func @transform_3(%arg0: i32) -> (i32, i32) {
    %c0_i32 = arith.constant 0 : i32
    %c0_i32_0 = arith.constant 0 : i32
    %c0_i32_1 = arith.constant 0 : i32
    return %c0_i32, %c0_i32_0 : i32, i32
  }
  func.func @transform_4(%arg0: i32) -> (i32, i32) {
    %c0_i32 = arith.constant 0 : i32
    %c0_i32_0 = arith.constant 0 : i32
    %c0_i32_1 = arith.constant 0 : i32
    return %c0_i32, %c0_i32_0 : i32, i32
  }
  func.func @transform_5(%arg0: i32) -> (i32, i32) {
    %c0_i32 = arith.constant 0 : i32
    %c0_i32_0 = arith.constant 0 : i32
    %c0_i32_1 = arith.constant 0 : i32
    return %c0_i32, %c0_i32_0 : i32, i32
  }
  func.func @transform_6(%arg0: i32) -> (i32, i32) {
    %c0_i32 = arith.constant 0 : i32
    %c0_i32_0 = arith.constant 0 : i32
    %c0_i32_1 = arith.constant 0 : i32
    return %c0_i32, %c0_i32_0 : i32, i32
  }
  func.func @transform_7(%arg0: i32) -> (i32, i32) {
    %c0_i32 = arith.constant 0 : i32
    %c0_i32_0 = arith.constant 0 : i32
    return %arg0, %c0_i32 : i32, i32
  }
}

</mosaic_0001>

<bundles_post_ra>
// kernel: tpu_custom_call.1
= control target key start
LH: loop header
LB: loop body
LE: loop exit
PB: predicated region body
PF: predicated region fallthrough
CT: control target
= control target key end

     0   :  { %v3324_v2 = vmov 0   ;;  %s4362_s0 = inlined_call_operand.vmem [shape: bf16[8,128], index: 0, kind: input, shape index: {}]   ;;  %s4363_s1 = inlined_call_operand.vmem [shape: bf16[128,256], index: 1, kind: input, shape index: {}]   ;;  %s4364_s2 = inlined_call_operand.vmem [shape: f32[1,256], index: 2, kind: input, shape index: {}]   ;;  %s4365_s3 = inlined_call_operand.vmem [shape: bf16[256,512], index: 3, kind: input, shape index: {}]   ;;  %s4366_s4 = inlined_call_operand.vmem [shape: f32[1,512], index: 4, kind: input, shape index: {}]   ;;  %s4367_s5 = inlined_call_operand.vmem [shape: bf16[512,784], index: 5, kind: input, shape index: {}]   ;;  %s4368_s6 = inlined_call_operand.vmem [shape: f32[1,784], index: 6, kind: input, shape index: {}]   ;;  %s4369_s7 = inlined_call_operand.hbm [shape: f32[8,784], index: 7, kind: output, shape index: {}]  }
   0x1   :  { %v2846_v0 = vld [vmem:[%s4363_s1 + $0x4] ss:$8 sps:$4 sm:$0xff]   ;;  %v2848_v1 = vld [vmem:[%s4363_s1] ss:$8 sps:$4 sm:$0xff]   ;;  %169 = vmatprep.mubr.bf16.mxu0 %v3324_v2  ;;  %v2849_v3 = vld [vmem:[%s4363_s1 + $0x14] ss:$8 sps:$4 sm:$0xff]  }
   0x2   :  { %137 = vmatprep.subr.bf16.mxu0 %v2846_v0  ;;  %v2851_v4 = vld [vmem:[%s4363_s1 + $0x10] ss:$8 sps:$4 sm:$0xff]   ;;  %v2852_v5 = vld [vmem:[%s4363_s1 + $0x24] ss:$8 sps:$4 sm:$0xff]   ;;  %v2854_v6 = vld [vmem:[%s4363_s1 + $0x20] ss:$8 sps:$4 sm:$0xff]  }
   0x3   :  { %138 = vmatpush1.bf16.msra.mxu0 %v2848_v1  ;;  %v2855_v7 = vld [vmem:[%s4363_s1 + $0x34] ss:$8 sps:$4 sm:$0xff]   ;;  %v2857_v8 = vld [vmem:[%s4363_s1 + $0x30] ss:$8 sps:$4 sm:$0xff]   ;;  %v2858_v10 = vld [vmem:[%s4363_s1 + $0x44] ss:$8 sps:$4 sm:$0xff]  }
   0x4   :  { %139 = vmatprep.subr.bf16.mxu0 %v2849_v3  ;;  %v2870_v9 = vld [vmem:[%s4365_s3 + $0x4] ss:$16 sps:$4 sm:$0xff]   ;;  %v2875_v11 = vld [vmem:[%s4365_s3] ss:$16 sps:$4 sm:$0xff]   ;;  %v2874_v26 = vld [vmem:[%s4365_s3 + $0xc] ss:$16 sps:$4 sm:$0xff]  }
   0x5   :  { %588 = vmatprep.subr.bf16.mxu1 %v2870_v9  ;;  %v2876_v12 = vld [vmem:[%s4365_s3 + $0x24] ss:$16 sps:$4 sm:$0xff]   ;;  %v2860_v13 = vld [vmem:[%s4363_s1 + $0x40] ss:$8 sps:$4 sm:$0xff]   ;;  %v2863_v17 = vld [vmem:[%s4363_s1 + $0x50] ss:$8 sps:$4 sm:$0xff]  }
   0x6   :  { %v2861_v14 = vld [vmem:[%s4363_s1 + $0x54] ss:$8 sps:$4 sm:$0xff]   ;;  %589 = vmatpush1.bf16.msra.mxu1 %v2875_v11  ;;  %v2881_v15 = vld [vmem:[%s4365_s3 + $0x20] ss:$16 sps:$4 sm:$0xff]   ;;  %v2864_v18 = vld [vmem:[%s4363_s1 + $0x64] ss:$8 sps:$4 sm:$0xff]  }
   0x7   :  { %140 = vmatpush1.bf16.msra.mxu0 %v2851_v4  ;;  %590 = vmatprep.subr.bf16.mxu1 %v2876_v12  ;;  %v2882_v16 = vld [vmem:[%s4365_s3 + $0x44] ss:$16 sps:$4 sm:$0xff]   ;;  %v2887_v19 = vld [vmem:[%s4365_s3 + $0x40] ss:$16 sps:$4 sm:$0xff]   ;;  %v2872_v30 = vld [vmem:[%s4365_s3 + $0x8] ss:$16 sps:$4 sm:$0xff]  }
   0x8   :  { %141 = vmatprep.subr.bf16.mxu0 %v2852_v5  ;;  %v2888_v20 = vld [vmem:[%s4365_s3 + $0x64] ss:$16 sps:$4 sm:$0xff]   ;;  %v2866_v21 = vld [vmem:[%s4363_s1 + $0x60] ss:$8 sps:$4 sm:$0xff]   ;;  %v2869_v25 = vld [vmem:[%s4363_s1 + $0x70] ss:$8 sps:$4 sm:$0xff]  }
   0x9   :  { %v2867_v22 = vld [vmem:[%s4363_s1 + $0x74] ss:$8 sps:$4 sm:$0xff]   ;;  %v2893_v23 = vld [vmem:[%s4365_s3 + $0x60] ss:$16 sps:$4 sm:$0xff]   ;;  %v2878_v34 = vld [vmem:[%s4365_s3 + $0x28] ss:$16 sps:$4 sm:$0xff]  }
   0xa   :  { %591 = vmatpush1.bf16.msra.mxu1 %v2881_v15  ;;  %v2894_v24 = vld [vmem:[%s4365_s3 + $0x84] ss:$16 sps:$4 sm:$0xff]   ;;  %v2899_v27 = vld [vmem:[%s4365_s3 + $0x80] ss:$16 sps:$4 sm:$0xff]   ;;  %v2880_v31 = vld [vmem:[%s4365_s3 + $0x2c] ss:$16 sps:$4 sm:$0xff]  }
   0xb   :  { %142 = vmatpush1.bf16.msra.mxu0 %v2854_v6  ;;  %592 = vmatprep.subr.bf16.mxu1 %v2882_v16  ;;  %v2900_v28 = vld [vmem:[%s4365_s3 + $0xa4] ss:$16 sps:$4 sm:$0xff]   ;;  %v28_v29 = vld [vmem:[%s4362_s0] sm:$0xf]  ;;  %v2886_v35 = vld [vmem:[%s4365_s3 + $0x4c] ss:$16 sps:$4 sm:$0xff]  }
   0xc   :  { %143 = vmatprep.subr.bf16.mxu0 %v2855_v7  ;;  %v2905_v32 = vld [vmem:[%s4365_s3 + $0xa0] ss:$16 sps:$4 sm:$0xff]   ;;  %v2906_v33 = vld [vmem:[%s4365_s3 + $0xc4] ss:$16 sps:$4 sm:$0xff]   ;;  %v2884_v38 = vld [vmem:[%s4365_s3 + $0x48] ss:$16 sps:$4 sm:$0xff]  }
   0xd   :  { %v2911_v36 = vld [vmem:[%s4365_s3 + $0xc0] ss:$16 sps:$4 sm:$0xff]   ;;  %v2912_v37 = vld [vmem:[%s4365_s3 + $0xe4] ss:$16 sps:$4 sm:$0xff]   ;;  %v2892_v39 = vld [vmem:[%s4365_s3 + $0x6c] ss:$16 sps:$4 sm:$0xff]  }
   0xe   :  { %593 = vmatpush1.bf16.msra.mxu1 %v2887_v19  ;;  %v2917_v40 = vld [vmem:[%s4365_s3 + $0xe0] ss:$16 sps:$4 sm:$0xff]   ;;  %v2918_v41 = vld [vmem:[%s4365_s3 + $0x104] ss:$16 sps:$4 sm:$0xff]   ;;  %v2890_v42 = vld [vmem:[%s4365_s3 + $0x68] ss:$16 sps:$4 sm:$0xff]  }
   0xf   :  { %144 = vmatpush1.bf16.msra.mxu0 %v2857_v8  ;;  %594 = vmatprep.subr.bf16.mxu1 %v2888_v20  ;;  %v2898_v43 = vld [vmem:[%s4365_s3 + $0x8c] ss:$16 sps:$4 sm:$0xff]   ;;  %v2923_v44 = vld [vmem:[%s4365_s3 + $0x100] ss:$16 sps:$4 sm:$0xff]   ;;  %v2924_v45 = vld [vmem:[%s4365_s3 + $0x124] ss:$16 sps:$4 sm:$0xff]  }
  0x10   :  { %145 = vmatprep.subr.bf16.mxu0 %v2858_v10  ;;  %v2896_v46 = vld [vmem:[%s4365_s3 + $0x88] ss:$16 sps:$4 sm:$0xff]   ;;  %v2929_v47 = vld [vmem:[%s4365_s3 + $0x120] ss:$16 sps:$4 sm:$0xff]   ;;  %v2904_v48 = vld [vmem:[%s4365_s3 + $0xac] ss:$16 sps:$4 sm:$0xff]  }
  0x11   :  { %v2930_v49 = vld [vmem:[%s4365_s3 + $0x144] ss:$16 sps:$4 sm:$0xff]   ;;  %v2902_v50 = vld [vmem:[%s4365_s3 + $0xa8] ss:$16 sps:$4 sm:$0xff]   ;;  %v2935_v51 = vld [vmem:[%s4365_s3 + $0x140] ss:$16 sps:$4 sm:$0xff]  }
  0x12   :  { %595 = vmatpush1.bf16.msra.mxu1 %v2893_v23  ;;  %v2910_v52 = vld [vmem:[%s4365_s3 + $0xcc] ss:$16 sps:$4 sm:$0xff]   ;;  %v2936_v53 = vld [vmem:[%s4365_s3 + $0x164] ss:$16 sps:$4 sm:$0xff]   ;;  %v2908_v54 = vld [vmem:[%s4365_s3 + $0xc8] ss:$16 sps:$4 sm:$0xff]  }
  0x13   :  { %146 = vmatpush1.bf16.msra.mxu0 %v2860_v13  ;;  %596 = vmatprep.subr.bf16.mxu1 %v2894_v24  ;;  %v2941_v55 = vld [vmem:[%s4365_s3 + $0x160] ss:$16 sps:$4 sm:$0xff]   ;;  %v2916_v56 = vld [vmem:[%s4365_s3 + $0xec] ss:$16 sps:$4 sm:$0xff]   ;;  %v2942_v57 = vld [vmem:[%s4365_s3 + $0x184] ss:$16 sps:$4 sm:$0xff]  }
  0x14   :  { %147 = vmatprep.subr.bf16.mxu0 %v2861_v14  ;;  %v2914_v58 = vld [vmem:[%s4365_s3 + $0xe8] ss:$16 sps:$4 sm:$0xff]   ;;  %v2947_v59 = vld [vmem:[%s4365_s3 + $0x180] ss:$16 sps:$4 sm:$0xff]   ;;  %v2922_v60 = vld [vmem:[%s4365_s3 + $0x10c] ss:$16 sps:$4 sm:$0xff]  }
  0x15   :  { %v2948_v61 = vld [vmem:[%s4365_s3 + $0x1a4] ss:$16 sps:$4 sm:$0xff]   ;;  %v2920_v62 = vld [vmem:[%s4365_s3 + $0x108] ss:$16 sps:$4 sm:$0xff]   ;;  %v2953_v63 = vld [vmem:[%s4365_s3 + $0x1a0] ss:$16 sps:$4 sm:$0xff]  }
  0x16   :  { %597 = vmatpush1.bf16.msra.mxu1 %v2899_v27  ;;  %v2928_v0 = vld [vmem:[%s4365_s3 + $0x12c] ss:$16 sps:$4 sm:$0xff]   ;;  %v2926_v1 = vld [vmem:[%s4365_s3 + $0x128] ss:$16 sps:$4 sm:$0xff]   ;;  %v2954_v10 = vld [vmem:[%s4365_s3 + $0x1c4] ss:$16 sps:$4 sm:$0xff]  }
  0x17   :  { %148 = vmatpush1.bf16.msra.mxu0 %v2863_v17  ;;  %598 = vmatprep.subr.bf16.mxu1 %v2900_v28  ;;  %v2934_v2 = vld [vmem:[%s4365_s3 + $0x14c] ss:$16 sps:$4 sm:$0xff]   ;;  %v2932_v3 = vld [vmem:[%s4365_s3 + $0x148] ss:$16 sps:$4 sm:$0xff]   ;;  %v2959_v13 = vld [vmem:[%s4365_s3 + $0x1c0] ss:$16 sps:$4 sm:$0xff]  }
  0x18   :  { %149 = vmatprep.subr.bf16.mxu0 %v2864_v18  ;;  %v2940_v4 = vld [vmem:[%s4365_s3 + $0x16c] ss:$16 sps:$4 sm:$0xff]   ;;  %v2938_v5 = vld [vmem:[%s4365_s3 + $0x168] ss:$16 sps:$4 sm:$0xff]   ;;  %v2960_v14 = vld [vmem:[%s4365_s3 + $0x1e4] ss:$16 sps:$4 sm:$0xff]  }
  0x19   :  { %v2946_v6 = vld [vmem:[%s4365_s3 + $0x18c] ss:$16 sps:$4 sm:$0xff]   ;;  %v2944_v7 = vld [vmem:[%s4365_s3 + $0x188] ss:$16 sps:$4 sm:$0xff]   ;;  %v2965_v17 = vld [vmem:[%s4365_s3 + $0x1e0] ss:$16 sps:$4 sm:$0xff]  }
  0x1a   :  { %599 = vmatpush1.bf16.msra.mxu1 %v2905_v32  ;;  %v2952_v8 = vld [vmem:[%s4365_s3 + $0x1ac] ss:$16 sps:$4 sm:$0xff]   ;;  %v2950_v9 = vld [vmem:[%s4365_s3 + $0x1a8] ss:$16 sps:$4 sm:$0xff]   ;;  %v2968_v18 = vld [vmem:[%s4367_s5 + $0x4] ss:$28 sps:$4 sm:$0xff]  }
  0x1b   :  { %150 = vmatpush1.bf16.msra.mxu0 %v2866_v21  ;;  %600 = vmatprep.subr.bf16.mxu1 %v2906_v33  ;;  %v2958_v11 = vld [vmem:[%s4365_s3 + $0x1cc] ss:$16 sps:$4 sm:$0xff]   ;;  %v2956_v12 = vld [vmem:[%s4365_s3 + $0x1c8] ss:$16 sps:$4 sm:$0xff]  }
  0x1c   :  { %151 = vmatprep.subr.bf16.mxu0 %v2867_v22  ;;  %v2964_v15 = vld [vmem:[%s4365_s3 + $0x1ec] ss:$16 sps:$4 sm:$0xff]   ;;  %v2962_v16 = vld [vmem:[%s4365_s3 + $0x1e8] ss:$16 sps:$4 sm:$0xff]  }
  0x1d   :  { %v2971_v19 = vld [vmem:[%s4367_s5 + $0xc] ss:$28 sps:$4 sm:$0xff]  }
  0x1e   :  { %601 = vmatpush1.bf16.msra.mxu1 %v2911_v36 }
  0x1f   :  { %152 = vmatpush1.bf16.msra.mxu0 %v2869_v25  ;;  %602 = vmatprep.subr.bf16.mxu1 %v2912_v37 }
  0x20   :  { %629 = vmatprep.subr.bf16.mxu0 %v2874_v26 }
  0x22   :  { %170 = vmatmul.mubr.bf16.vlgmr.msra.gmra.mrb[0].mxu0 %v28_v29  ;;  %603 = vmatpush1.bf16.msra.mxu1 %v2917_v40 }
  0x23   :  { %630 = vmatpush1.bf16.msra.mxu0 %v2872_v30  ;;  %604 = vmatprep.subr.bf16.mxu1 %v2918_v41 }
  0x24   :  { %631 = vmatprep.subr.bf16.mxu0 %v2880_v31 }
  0x26   :  { %605 = vmatpush1.bf16.msra.mxu1 %v2923_v44 }
  0x27   :  { %632 = vmatpush1.bf16.msra.mxu0 %v2878_v34  ;;  %606 = vmatprep.subr.bf16.mxu1 %v2924_v45 }
  0x28   :  { %633 = vmatprep.subr.bf16.mxu0 %v2886_v35 }
  0x2a   :  { %607 = vmatpush1.bf16.msra.mxu1 %v2929_v47 }
  0x2b   :  { %634 = vmatpush1.bf16.msra.mxu0 %v2884_v38  ;;  %608 = vmatprep.subr.bf16.mxu1 %v2930_v49 }
  0x2c   :  { %635 = vmatprep.subr.bf16.mxu0 %v2892_v39 }
  0x2e   :  { %609 = vmatpush1.bf16.msra.mxu1 %v2935_v51 }
  0x2f   :  { %636 = vmatpush1.bf16.msra.mxu0 %v2890_v42  ;;  %610 = vmatprep.subr.bf16.mxu1 %v2936_v53 }
  0x30   :  { %637 = vmatprep.subr.bf16.mxu0 %v2898_v43 }
  0x32   :  { %611 = vmatpush1.bf16.msra.mxu1 %v2941_v55 }
  0x33   :  { %638 = vmatpush1.bf16.msra.mxu0 %v2896_v46  ;;  %612 = vmatprep.subr.bf16.mxu1 %v2942_v57 }
  0x34   :  { %639 = vmatprep.subr.bf16.mxu0 %v2904_v48 }
  0x36   :  { %613 = vmatpush1.bf16.msra.mxu1 %v2947_v59 }
  0x37   :  { %640 = vmatpush1.bf16.msra.mxu0 %v2902_v50  ;;  %614 = vmatprep.subr.bf16.mxu1 %v2948_v61 }
  0x38   :  { %641 = vmatprep.subr.bf16.mxu0 %v2910_v52 }
  0x3a   :  { %615 = vmatpush1.bf16.msra.mxu1 %v2953_v63 }
  0x3b   :  { %642 = vmatpush1.bf16.msra.mxu0 %v2908_v54  ;;  %616 = vmatprep.subr.bf16.mxu1 %v2954_v10 }
  0x3c   :  { %643 = vmatprep.subr.bf16.mxu0 %v2916_v56 }
  0x3e   :  { %617 = vmatpush1.bf16.msra.mxu1 %v2959_v13 }
  0x3f   :  { %644 = vmatpush1.bf16.msra.mxu0 %v2914_v58  ;;  %618 = vmatprep.subr.bf16.mxu1 %v2960_v14 }
  0x40   :  { %645 = vmatprep.subr.bf16.mxu0 %v2922_v60 }
  0x42   :  { %619 = vmatpush1.bf16.msra.mxu1 %v2965_v17 }
  0x43   :  { %646 = vmatpush1.bf16.msra.mxu0 %v2920_v62  ;;  %2123 = vmatprep.subr.bf16.mxu1 %v2968_v18 }
  0x44   :  { %647 = vmatprep.subr.bf16.mxu0 %v2928_v0 }
  0x47   :  { %648 = vmatpush1.bf16.msra.mxu0 %v2926_v1 }
  0x48   :  { %649 = vmatprep.subr.bf16.mxu0 %v2934_v2 }
  0x4b   :  { %650 = vmatpush1.bf16.msra.mxu0 %v2932_v3 }
  0x4c   :  { %651 = vmatprep.subr.bf16.mxu0 %v2940_v4 }
  0x4f   :  { %652 = vmatpush1.bf16.msra.mxu0 %v2938_v5 }
  0x50   :  { %653 = vmatprep.subr.bf16.mxu0 %v2946_v6 }
  0x53   :  { %654 = vmatpush1.bf16.msra.mxu0 %v2944_v7 }
  0x54   :  { %655 = vmatprep.subr.bf16.mxu0 %v2952_v8 }
  0x57   :  { %656 = vmatpush1.bf16.msra.mxu0 %v2950_v9 }
  0x58   :  { %657 = vmatprep.subr.bf16.mxu0 %v2958_v11 }
  0x5b   :  { %658 = vmatpush1.bf16.msra.mxu0 %v2956_v12 }
  0x5c   :  { %659 = vmatprep.subr.bf16.mxu0 %v2964_v15 }
  0x5f   :  { %660 = vmatpush1.bf16.msra.mxu0 %v2962_v16 }
  0x60   :  { %2205 = vmatprep.subr.bf16.mxu0 %v2971_v19 }
  0x61   :  { %12 = vsyncpa [#allocation3], 0  ;;  %v47_v20 = vlaneseq  ;;  %v45_v23 = vld [vmem:[%s4364_s2] sm:$0x3]  ;;  %v2969_v37 = vld [vmem:[%s4367_s5 + $0x8] ss:$28 sps:$4 sm:$0xff]  }
  0x62   :  { %v2966_v36 = vld [vmem:[%s4367_s5] ss:$28 sps:$4 sm:$0xff]   ;;  %v2972_v41 = vld [vmem:[%s4367_s5 + $0x38] ss:$28 sps:$4 sm:$0xff]   ;;  %v2978_v45 = vld [vmem:[%s4367_s5 + $0x70] ss:$28 sps:$4 sm:$0xff]  }
  0x63   :  { %v3615_v21 = vshrl.u32 %v47_v20, 7  ;;  %v2974_v39 = vld [vmem:[%s4367_s5 + $0x3c] ss:$28 sps:$4 sm:$0xff]   ;;  %v2977_v40 = vld [vmem:[%s4367_s5 + $0x44] ss:$28 sps:$4 sm:$0xff]   ;;  %vm2462_vm0 = vcmask 130048  }
  0x64   :  { %v2975_v42 = vld [vmem:[%s4367_s5 + $0x40] ss:$28 sps:$4 sm:$0xff]   ;;  %v2980_v43 = vld [vmem:[%s4367_s5 + $0x74] ss:$28 sps:$4 sm:$0xff]   ;;  %v2986_v47 = vld [vmem:[%s4367_s5 + $0xac] ss:$28 sps:$4 sm:$0xff]  }
  0x65   :  { %v3618_v22 = vsub.s32 0, %v3615_v21  ;;  %v3624_v24 = vsub.s32 1, %v3615_v21  ;;  %v2983_v44 = vld [vmem:[%s4367_s5 + $0x7c] ss:$28 sps:$4 sm:$0xff]   ;;  %v2989_v48 = vld [vmem:[%s4367_s5 + $0xb4] ss:$28 sps:$4 sm:$0xff]  }
  0x66   :  { %v2981_v46 = vld [vmem:[%s4367_s5 + $0x78] ss:$28 sps:$4 sm:$0xff]   ;;  %v2984_v49 = vld [vmem:[%s4367_s5 + $0xa8] ss:$28 sps:$4 sm:$0xff]   ;;  %v2987_v50 = vld [vmem:[%s4367_s5 + $0xb0] ss:$28 sps:$4 sm:$0xff]  }
  0x67   :  { %v50_v25 = vrot.slane %v45_v23, %v3618_v22  ;;  %v54_v26 = vrot.slane %v45_v23, %v3624_v24  ;;  %v2992_v51 = vld [vmem:[%s4367_s5 + $0xe4] ss:$28 sps:$4 sm:$0xff]   ;;  %v2995_v52 = vld [vmem:[%s4367_s5 + $0xec] ss:$28 sps:$4 sm:$0xff]   ;;  %v2998_v55 = vld [vmem:[%s4367_s5 + $0x11c] ss:$28 sps:$4 sm:$0xff]  }
  0x68   :  { %v2990_v53 = vld [vmem:[%s4367_s5 + $0xe0] ss:$28 sps:$4 sm:$0xff]   ;;  %v2993_v54 = vld [vmem:[%s4367_s5 + $0xe8] ss:$28 sps:$4 sm:$0xff]   ;;  %v2996_v57 = vld [vmem:[%s4367_s5 + $0x118] ss:$28 sps:$4 sm:$0xff]  }
  0x69   :  { %v3001_v56 = vld [vmem:[%s4367_s5 + $0x124] ss:$28 sps:$4 sm:$0xff]   ;;  %v3004_v59 = vld [vmem:[%s4367_s5 + $0x154] ss:$28 sps:$4 sm:$0xff]   ;;  %v3007_v60 = vld [vmem:[%s4367_s5 + $0x15c] ss:$28 sps:$4 sm:$0xff]  }
  0x6a   :  { %v2999_v58 = vld [vmem:[%s4367_s5 + $0x120] ss:$28 sps:$4 sm:$0xff]   ;;  %v3002_v61 = vld [vmem:[%s4367_s5 + $0x150] ss:$28 sps:$4 sm:$0xff]   ;;  %v3005_v62 = vld [vmem:[%s4367_s5 + $0x158] ss:$28 sps:$4 sm:$0xff]  }
  0x6b   :  { %v3010_v63 = vld [vmem:[%s4367_s5 + $0x18c] ss:$28 sps:$4 sm:$0xff]   ;;  %v3013_v0 = vld [vmem:[%s4367_s5 + $0x194] ss:$28 sps:$4 sm:$0xff]   ;;  %v3016_v3 = vld [vmem:[%s4367_s5 + $0x1c4] ss:$28 sps:$4 sm:$0xff]  }
  0x6c   :  { %v3008_v1 = vld [vmem:[%s4367_s5 + $0x188] ss:$28 sps:$4 sm:$0xff]   ;;  %v3011_v2 = vld [vmem:[%s4367_s5 + $0x190] ss:$28 sps:$4 sm:$0xff]   ;;  %v3014_v5 = vld [vmem:[%s4367_s5 + $0x1c0] ss:$28 sps:$4 sm:$0xff]  }
  0x6d   :  { %v3019_v4 = vld [vmem:[%s4367_s5 + $0x1cc] ss:$28 sps:$4 sm:$0xff]   ;;  %v3022_v7 = vld [vmem:[%s4367_s5 + $0x1fc] ss:$28 sps:$4 sm:$0xff]   ;;  %v3025_v8 = vld [vmem:[%s4367_s5 + $0x204] ss:$28 sps:$4 sm:$0xff]  }
  0x6e   :  { %v3017_v6 = vld [vmem:[%s4367_s5 + $0x1c8] ss:$28 sps:$4 sm:$0xff]   ;;  %v3020_v9 = vld [vmem:[%s4367_s5 + $0x1f8] ss:$28 sps:$4 sm:$0xff]   ;;  %v3023_v10 = vld [vmem:[%s4367_s5 + $0x200] ss:$28 sps:$4 sm:$0xff]  }
  0x6f   :  { %v3028_v11 = vld [vmem:[%s4367_s5 + $0x234] ss:$28 sps:$4 sm:$0xff]   ;;  %v3031_v12 = vld [vmem:[%s4367_s5 + $0x23c] ss:$28 sps:$4 sm:$0xff]   ;;  %v3034_v15 = vld [vmem:[%s4367_s5 + $0x26c] ss:$28 sps:$4 sm:$0xff]  }
  0x70   :  { %v3026_v13 = vld [vmem:[%s4367_s5 + $0x230] ss:$28 sps:$4 sm:$0xff]   ;;  %v3029_v14 = vld [vmem:[%s4367_s5 + $0x238] ss:$28 sps:$4 sm:$0xff]   ;;  %v3032_v17 = vld [vmem:[%s4367_s5 + $0x268] ss:$28 sps:$4 sm:$0xff]  }
  0x71   :  { %v3037_v16 = vld [vmem:[%s4367_s5 + $0x274] ss:$28 sps:$4 sm:$0xff]   ;;  %v3040_v19 = vld [vmem:[%s4367_s5 + $0x2a4] ss:$28 sps:$4 sm:$0xff]   ;;  %v3043_v20 = vld [vmem:[%s4367_s5 + $0x2ac] ss:$28 sps:$4 sm:$0xff]  }
  0x72   :  { %v3035_v18 = vld [vmem:[%s4367_s5 + $0x270] ss:$28 sps:$4 sm:$0xff]   ;;  %v3038_v23 = vld [vmem:[%s4367_s5 + $0x2a0] ss:$28 sps:$4 sm:$0xff]  }
  0xf5   :  { %v171_v27 = vpop.f32.mrb[0].mxu0 }
  0xf6   :  { %v172_v28 = vadd.f32 %v171_v27, %v50_v25  ;;  %v173_v29 = vpop.f32.mrb[1].mxu0  ;;  %v3041_v25 = vld [vmem:[%s4367_s5 + $0x2a8] ss:$28 sps:$4 sm:$0xff]  }
  0xf7   :  { %v174_v30 = vadd.f32 %v173_v29, %v54_v26  ;;  %v175_v31 = vpop.f32.mrb[2].mxu0  ;;  %v3046_v26 = vld [vmem:[%s4367_s5 + $0x2dc] ss:$28 sps:$4 sm:$0xff]   ;;  %v3049_v27 = vld [vmem:[%s4367_s5 + $0x2e4] ss:$28 sps:$4 sm:$0xff]  }
  0xf8   :  { %v178_v32 = vmax.f32 %v172_v28, 0.0  ;;  %v176_v33 = vpop.f32.mrb[3].mxu0  ;;  %v3044_v28 = vld [vmem:[%s4367_s5 + $0x2d8] ss:$28 sps:$4 sm:$0xff]   ;;  %v3047_v29 = vld [vmem:[%s4367_s5 + $0x2e0] ss:$28 sps:$4 sm:$0xff]  }
  0xf9   :  { %v179_v34 = vmax.f32 %v174_v30, 0.0  ;;  %v3052_v30 = vld [vmem:[%s4367_s5 + $0x314] ss:$28 sps:$4 sm:$0xff]   ;;  %v3055_v31 = vld [vmem:[%s4367_s5 + $0x31c] ss:$28 sps:$4 sm:$0xff]  }
  0xfa   :  { %v180_v38 = vpack.c.bf16 %v178_v32, %v178_v32  ;;  %v3050_v32 = vld [vmem:[%s4367_s5 + $0x310] ss:$28 sps:$4 sm:$0xff]   ;;  %v3053_v33 = vld [vmem:[%s4367_s5 + $0x318] ss:$28 sps:$4 sm:$0xff]  }
  0xfb   :  { %v181_v35 = vpack.c.bf16 %v179_v34, %v179_v34  ;;  %v3058_v34 = vld [vmem:[%s4367_s5 + $0x34c] ss:$28 sps:$4 sm:$0xff]  }
  0xfd   :  { %620 = vmatprep.mubr.bf16.mxu1 %v181_v35  ;;  %661 = vmatprep.mubr.bf16.mxu0 %v181_v35  ;;  %v3061_v35 = vld [vmem:[%s4367_s5 + $0x354] ss:$28 sps:$4 sm:$0xff]  }
  0xfe   :  { %621 = vmatmul.mubr.bf16.vlgmr.msra.gmra.mrb[0].mxu1 %v180_v38  ;;  %662 = vmatmul.mubr.bf16.vlgmr.msra.gmra.mrb[4].mxu0 %v180_v38  ;;  %v3064_v38 = vld [vmem:[%s4367_s5 + $0x384] ss:$28 sps:$4 sm:$0xff]  }
  0xff   :  { %2124 = vmatpush1.bf16.msra.mxu1 %v2966_v36  ;;  %2206 = vmatpush1.bf16.msra.mxu0 %v2969_v37  ;;  %v3056_v36 = vld [vmem:[%s4367_s5 + $0x348] ss:$28 sps:$4 sm:$0xff]   ;;  %v3059_v37 = vld [vmem:[%s4367_s5 + $0x350] ss:$28 sps:$4 sm:$0xff]  }
 0x100   :  { %2125 = vmatprep.subr.bf16.mxu1 %v2974_v39  ;;  %2207 = vmatprep.subr.bf16.mxu0 %v2977_v40  ;;  %v3067_v39 = vld [vmem:[%s4367_s5 + $0x38c] ss:$28 sps:$4 sm:$0xff]   ;;  %v3823_v40 = vld [vmem:[%s4366_s4] sm:$0xf] }
 0x103   :  { %2126 = vmatpush1.bf16.msra.mxu1 %v2972_v41  ;;  %2208 = vmatpush1.bf16.msra.mxu0 %v2975_v42  ;;  %v262_v41 = vsub.s32 3, %v3615_v21  ;;  %v251_v42 = vrot.slane %v3823_v40, %v3618_v22 }
 0x104   :  { %2127 = vmatprep.subr.bf16.mxu1 %v2980_v43  ;;  %2209 = vmatprep.subr.bf16.mxu0 %v2983_v44  ;;  %v255_v43 = vrot.slane %v3823_v40, %v3624_v24 }
 0x105   :  { %v263_v44 = vrot.slane %v3823_v40, %v262_v41 }
 0x107   :  { %2128 = vmatpush1.bf16.msra.mxu1 %v2978_v45  ;;  %2210 = vmatpush1.bf16.msra.mxu0 %v2981_v46 }
 0x108   :  { %2129 = vmatprep.subr.bf16.mxu1 %v2986_v47  ;;  %2211 = vmatprep.subr.bf16.mxu0 %v2989_v48 }
 0x10b   :  { %2130 = vmatpush1.bf16.msra.mxu1 %v2984_v49  ;;  %2212 = vmatpush1.bf16.msra.mxu0 %v2987_v50 }
 0x10c   :  { %2131 = vmatprep.subr.bf16.mxu1 %v2992_v51  ;;  %2213 = vmatprep.subr.bf16.mxu0 %v2995_v52 }
 0x10f   :  { %2132 = vmatpush1.bf16.msra.mxu1 %v2990_v53  ;;  %2214 = vmatpush1.bf16.msra.mxu0 %v2993_v54 }
 0x110   :  { %2133 = vmatprep.subr.bf16.mxu1 %v2998_v55  ;;  %2215 = vmatprep.subr.bf16.mxu0 %v3001_v56 }
 0x113   :  { %2134 = vmatpush1.bf16.msra.mxu1 %v2996_v57  ;;  %2216 = vmatpush1.bf16.msra.mxu0 %v2999_v58 }
 0x114   :  { %2135 = vmatprep.subr.bf16.mxu1 %v3004_v59  ;;  %2217 = vmatprep.subr.bf16.mxu0 %v3007_v60  ;;  %v3062_v60 = vld [vmem:[%s4367_s5 + $0x380] ss:$28 sps:$4 sm:$0xff]  }
 0x117   :  { %2136 = vmatpush1.bf16.msra.mxu1 %v3002_v61  ;;  %2218 = vmatpush1.bf16.msra.mxu0 %v3005_v62  ;;  %v3065_v61 = vld [vmem:[%s4367_s5 + $0x388] ss:$28 sps:$4 sm:$0xff]  }
 0x118   :  { %2137 = vmatprep.subr.bf16.mxu1 %v3010_v63  ;;  %2219 = vmatprep.subr.bf16.mxu0 %v3013_v0  ;;  %v3070_v63 = vld [vmem:[%s4367_s5 + $0x3bc] ss:$28 sps:$4 sm:$0xff]   ;;  %v3073_v0 = vld [vmem:[%s4367_s5 + $0x3c4] ss:$28 sps:$4 sm:$0xff]  }
 0x11b   :  { %2138 = vmatpush1.bf16.msra.mxu1 %v3008_v1  ;;  %2220 = vmatpush1.bf16.msra.mxu0 %v3011_v2  ;;  %v3068_v2 = vld [vmem:[%s4367_s5 + $0x3b8] ss:$28 sps:$4 sm:$0xff]  }
 0x11c   :  { %2139 = vmatprep.subr.bf16.mxu1 %v3016_v3  ;;  %2221 = vmatprep.subr.bf16.mxu0 %v3019_v4  ;;  %v3071_v3 = vld [vmem:[%s4367_s5 + $0x3c0] ss:$28 sps:$4 sm:$0xff]   ;;  %v3076_v4 = vld [vmem:[%s4367_s5 + $0x3f4] ss:$28 sps:$4 sm:$0xff]  }
 0x11f   :  { %2140 = vmatpush1.bf16.msra.mxu1 %v3014_v5  ;;  %2222 = vmatpush1.bf16.msra.mxu0 %v3017_v6  ;;  %v3079_v5 = vld [vmem:[%s4367_s5 + $0x3fc] ss:$28 sps:$4 sm:$0xff]   ;;  %v3074_v6 = vld [vmem:[%s4367_s5 + $0x3f0] ss:$28 sps:$4 sm:$0xff]  }
 0x120   :  { %2141 = vmatprep.subr.bf16.mxu1 %v3022_v7  ;;  %2223 = vmatprep.subr.bf16.mxu0 %v3025_v8  ;;  %v3077_v7 = vld [vmem:[%s4367_s5 + $0x3f8] ss:$28 sps:$4 sm:$0xff]   ;;  %v3082_v8 = vld [vmem:[%s4367_s5 + $0x42c] ss:$28 sps:$4 sm:$0xff]  }
 0x123   :  { %2142 = vmatpush1.bf16.msra.mxu1 %v3020_v9  ;;  %2224 = vmatpush1.bf16.msra.mxu0 %v3023_v10  ;;  %v3085_v9 = vld [vmem:[%s4367_s5 + $0x434] ss:$28 sps:$4 sm:$0xff]   ;;  %v3080_v10 = vld [vmem:[%s4367_s5 + $0x428] ss:$28 sps:$4 sm:$0xff]  }
 0x124   :  { %2143 = vmatprep.subr.bf16.mxu1 %v3028_v11  ;;  %2225 = vmatprep.subr.bf16.mxu0 %v3031_v12  ;;  %v3083_v11 = vld [vmem:[%s4367_s5 + $0x430] ss:$28 sps:$4 sm:$0xff]   ;;  %v3088_v12 = vld [vmem:[%s4367_s5 + $0x464] ss:$28 sps:$4 sm:$0xff]  }
 0x127   :  { %2144 = vmatpush1.bf16.msra.mxu1 %v3026_v13  ;;  %2226 = vmatpush1.bf16.msra.mxu0 %v3029_v14  ;;  %v3091_v13 = vld [vmem:[%s4367_s5 + $0x46c] ss:$28 sps:$4 sm:$0xff]   ;;  %v3086_v14 = vld [vmem:[%s4367_s5 + $0x460] ss:$28 sps:$4 sm:$0xff]  }
 0x128   :  { %2145 = vmatprep.subr.bf16.mxu1 %v3034_v15  ;;  %2227 = vmatprep.subr.bf16.mxu0 %v3037_v16  ;;  %v3089_v15 = vld [vmem:[%s4367_s5 + $0x468] ss:$28 sps:$4 sm:$0xff]   ;;  %v3094_v16 = vld [vmem:[%s4367_s5 + $0x49c] ss:$28 sps:$4 sm:$0xff]  }
 0x12b   :  { %2146 = vmatpush1.bf16.msra.mxu1 %v3032_v17  ;;  %2228 = vmatpush1.bf16.msra.mxu0 %v3035_v18  ;;  %v3097_v17 = vld [vmem:[%s4367_s5 + $0x4a4] ss:$28 sps:$4 sm:$0xff]   ;;  %v3092_v18 = vld [vmem:[%s4367_s5 + $0x498] ss:$28 sps:$4 sm:$0xff]  }
 0x12c   :  { %2147 = vmatprep.subr.bf16.mxu1 %v3040_v19  ;;  %2229 = vmatprep.subr.bf16.mxu0 %v3043_v20  ;;  %v3095_v19 = vld [vmem:[%s4367_s5 + $0x4a0] ss:$28 sps:$4 sm:$0xff]   ;;  %v3100_v20 = vld [vmem:[%s4367_s5 + $0x4d4] ss:$28 sps:$4 sm:$0xff]  }
 0x12f   :  { %2148 = vmatpush1.bf16.msra.mxu1 %v3038_v23  ;;  %2230 = vmatpush1.bf16.msra.mxu0 %v3041_v25  ;;  %v3103_v23 = vld [vmem:[%s4367_s5 + $0x4dc] ss:$28 sps:$4 sm:$0xff]   ;;  %v3098_v25 = vld [vmem:[%s4367_s5 + $0x4d0] ss:$28 sps:$4 sm:$0xff]  }
 0x130   :  { %2149 = vmatprep.subr.bf16.mxu1 %v3046_v26  ;;  %2231 = vmatprep.subr.bf16.mxu0 %v3049_v27  ;;  %v3101_v26 = vld [vmem:[%s4367_s5 + $0x4d8] ss:$28 sps:$4 sm:$0xff]   ;;  %v3106_v27 = vld [vmem:[%s4367_s5 + $0x50c] ss:$28 sps:$4 sm:$0xff]  }
 0x133   :  { %2150 = vmatpush1.bf16.msra.mxu1 %v3044_v28  ;;  %2232 = vmatpush1.bf16.msra.mxu0 %v3047_v29  ;;  %v3109_v28 = vld [vmem:[%s4367_s5 + $0x514] ss:$28 sps:$4 sm:$0xff]   ;;  %v3104_v29 = vld [vmem:[%s4367_s5 + $0x508] ss:$28 sps:$4 sm:$0xff]  }
 0x134   :  { %2151 = vmatprep.subr.bf16.mxu1 %v3052_v30  ;;  %2233 = vmatprep.subr.bf16.mxu0 %v3055_v31  ;;  %v3107_v30 = vld [vmem:[%s4367_s5 + $0x510] ss:$28 sps:$4 sm:$0xff]   ;;  %v3112_v31 = vld [vmem:[%s4367_s5 + $0x544] ss:$28 sps:$4 sm:$0xff]  }
 0x137   :  { %2152 = vmatpush1.bf16.msra.mxu1 %v3050_v32  ;;  %2234 = vmatpush1.bf16.msra.mxu0 %v3053_v33  ;;  %v3115_v32 = vld [vmem:[%s4367_s5 + $0x54c] ss:$28 sps:$4 sm:$0xff]   ;;  %v3110_v33 = vld [vmem:[%s4367_s5 + $0x540] ss:$28 sps:$4 sm:$0xff]  }
 0x138   :  { %2153 = vmatprep.subr.bf16.mxu1 %v3058_v34  ;;  %2235 = vmatprep.subr.bf16.mxu0 %v3061_v35  ;;  %v3113_v34 = vld [vmem:[%s4367_s5 + $0x548] ss:$28 sps:$4 sm:$0xff]   ;;  %v3118_v35 = vld [vmem:[%s4367_s5 + $0x57c] ss:$28 sps:$4 sm:$0xff]  }
 0x13b   :  { %2154 = vmatpush1.bf16.msra.mxu1 %v3056_v36  ;;  %2236 = vmatpush1.bf16.msra.mxu0 %v3059_v37  ;;  %v3121_v36 = vld [vmem:[%s4367_s5 + $0x584] ss:$28 sps:$4 sm:$0xff]   ;;  %v3116_v37 = vld [vmem:[%s4367_s5 + $0x578] ss:$28 sps:$4 sm:$0xff]  }
 0x13c   :  { %2164 = vmatprep.subr.bf16.mxu1 %v3064_v38  ;;  %2246 = vmatprep.subr.bf16.mxu0 %v3067_v39  ;;  %v3119_v38 = vld [vmem:[%s4367_s5 + $0x580] ss:$28 sps:$4 sm:$0xff]   ;;  %v3124_v39 = vld [vmem:[%s4367_s5 + $0x5b4] ss:$28 sps:$4 sm:$0xff]  }
 0x1d1   :  { %v622_v45 = vpop.f32.mrb[0].mxu1  ;;  %v3833_v46 = vpop.f32.mrb[4].mxu0 }
 0x1d2   :  { %v623_v47 = vadd.f32 %v622_v45, %v251_v42  ;;  %v624_v48 = vpop.f32.mrb[1].mxu1  ;;  %v665_v49 = vpop.f32.mrb[5].mxu0  ;;  %v3127_v42 = vld [vmem:[%s4367_s5 + $0x5bc] ss:$28 sps:$4 sm:$0xff]   ;;  %v3130_v45 = vld [vmem:[%s4367_s5 + $0x5ec] ss:$28 sps:$4 sm:$0xff]  }
 0x1d3   :  { %v625_v50 = vadd.f32 %v624_v48, %v255_v43  ;;  %v666_v51 = vadd.f32 %v665_v49, %v263_v44  ;;  %v626_v52 = vpop.f32.mrb[2].mxu1  ;;  %v667_v53 = vpop.f32.mrb[6].mxu0  ;;  %v3122_v43 = vld [vmem:[%s4367_s5 + $0x5b0] ss:$28 sps:$4 sm:$0xff]   ;;  %v3125_v44 = vld [vmem:[%s4367_s5 + $0x5b8] ss:$28 sps:$4 sm:$0xff]  }
 0x1d4   :  { %v670_v54 = vmax.f32 %v623_v47, 0.0  ;;  %v627_v55 = vpop.f32.mrb[3].mxu1  ;;  %v668_v56 = vpop.f32.mrb[7].mxu0  ;;  %v3133_v47 = vld [vmem:[%s4367_s5 + $0x5f4] ss:$28 sps:$4 sm:$0xff]  }
 0x1d5   :  { %v671_v57 = vmax.f32 %v625_v50, 0.0  ;;  %v673_v58 = vmax.f32 %v666_v51, 0.0  ;;  %v3128_v48 = vld [vmem:[%s4367_s5 + $0x5e8] ss:$28 sps:$4 sm:$0xff]   ;;  %v3131_v49 = vld [vmem:[%s4367_s5 + $0x5f0] ss:$28 sps:$4 sm:$0xff]  }
 0x1d6   :  { %v3843_v62 = vpack.c.bf16 %v670_v54, %v670_v54  ;;  %v3136_v50 = vld [vmem:[%s4367_s5 + $0x624] ss:$28 sps:$4 sm:$0xff]   ;;  %v3139_v51 = vld [vmem:[%s4367_s5 + $0x62c] ss:$28 sps:$4 sm:$0xff]   ;;  %v258_v54 = vsub.s32 2, %v3615_v21 }
 0x1d7   :  { %v3835_v59 = vpack.c.bf16 %v671_v57, %v671_v57  ;;  %v3853_v1 = vpack.c.bf16 %v673_v58, %v673_v58  ;;  %v3134_v52 = vld [vmem:[%s4367_s5 + $0x620] ss:$28 sps:$4 sm:$0xff]   ;;  %v3137_v53 = vld [vmem:[%s4367_s5 + $0x628] ss:$28 sps:$4 sm:$0xff]   ;;  %v3140_v57 = vld [vmem:[%s4367_s5 + $0x658] ss:$28 sps:$4 sm:$0xff]  }
 0x1d8   :  { %v3142_v55 = vld [vmem:[%s4367_s5 + $0x65c] ss:$28 sps:$4 sm:$0xff]   ;;  %v3145_v56 = vld [vmem:[%s4367_s5 + $0x664] ss:$28 sps:$4 sm:$0xff]  }
 0x1d9   :  { %2155 = vmatprep.mubr.bf16.mxu1 %v3835_v59  ;;  %2237 = vmatprep.mubr.bf16.mxu0 %v3835_v59  ;;  %v3143_v58 = vld [vmem:[%s4367_s5 + $0x660] ss:$28 sps:$4 sm:$0xff]  }
 0x1da   :  { %2156 = vmatmul.mubr.bf16.vlgmr.msra.gmra.mrb[4].mxu1 %v3843_v62  ;;  %2238 = vmatmul.mubr.bf16.vlgmr.msra.gmra.mrb[8].mxu0 %v3843_v62 }
 0x1db   :  { %2165 = vmatpush1.bf16.msra.mxu1 %v3062_v60  ;;  %2247 = vmatpush1.bf16.msra.mxu0 %v3065_v61  ;;  %v259_v60 = vrot.slane %v3823_v40, %v258_v54  ;;  %v3148_v61 = vld [vmem:[%s4367_s5 + $0x694] ss:$28 sps:$4 sm:$0xff]  }
 0x1dc   :  { %2196 = vmatprep.mubr.bf16.mxu1 %v3853_v1  ;;  %2278 = vmatprep.mubr.bf16.mxu0 %v3853_v1  ;;  %v3149_v40 = vld [vmem:[%s4367_s5 + $0x698] ss:$28 sps:$4 sm:$0xff]  }
 0x1dd   :  { %2166 = vmatprep.subr.bf16.mxu1 %v3070_v63  ;;  %2248 = vmatprep.subr.bf16.mxu0 %v3073_v0  ;;  %v3151_v63 = vld [vmem:[%s4367_s5 + $0x69c] ss:$28 sps:$4 sm:$0xff]   ;;  %v3146_v0 = vld [vmem:[%s4367_s5 + $0x690] ss:$28 sps:$4 sm:$0xff]  }
 0x1df   :  { %2167 = vmatpush1.bf16.msra.mxu1 %v3068_v2  ;;  %2249 = vmatpush1.bf16.msra.mxu0 %v3071_v3  ;;  %v664_v2 = vadd.f32 %v3833_v46, %v259_v60  ;;  %v3154_v3 = vld [vmem:[%s4367_s5 + $0x6cc] ss:$28 sps:$4 sm:$0xff]   ;;  %v3216_v60 = vld [vmem:[%s4367_s5 + $0x600] ss:$28 sps:$4 sm:$0xff]  }
 0x1e0   :  { %2168 = vmatprep.subr.bf16.mxu1 %v3076_v4  ;;  %2250 = vmatprep.subr.bf16.mxu0 %v3079_v5  ;;  %v3157_v4 = vld [vmem:[%s4367_s5 + $0x6d4] ss:$28 sps:$4 sm:$0xff]   ;;  %v3152_v5 = vld [vmem:[%s4367_s5 + $0x6c8] ss:$28 sps:$4 sm:$0xff]  }
 0x1e1   :  { %v3155_v46 = vld [vmem:[%s4367_s5 + $0x6d0] ss:$28 sps:$4 sm:$0xff]  }
 0x1e3   :  { %2169 = vmatpush1.bf16.msra.mxu1 %v3074_v6  ;;  %2251 = vmatpush1.bf16.msra.mxu0 %v3077_v7  ;;  %v672_v6 = vmax.f32 %v664_v2, 0.0  ;;  %v3160_v7 = vld [vmem:[%s4367_s5 + $0x14] ss:$28 sps:$4 sm:$0xff]  }
 0x1e4   :  { %2170 = vmatprep.subr.bf16.mxu1 %v3082_v8  ;;  %2252 = vmatprep.subr.bf16.mxu0 %v3085_v9  ;;  %v3161_v8 = vld [vmem:[%s4367_s5 + $0x1d8] ss:$28 sps:$4 sm:$0xff]   ;;  %v3158_v9 = vld [vmem:[%s4367_s5 + $0x10] ss:$28 sps:$4 sm:$0xff]  }
 0x1e5   :  { %v3218_v2 = vld [vmem:[%s4367_s5 + $0x2b0] ss:$28 sps:$4 sm:$0xff]  }
 0x1e7   :  { %2171 = vmatpush1.bf16.msra.mxu1 %v3080_v10  ;;  %2253 = vmatpush1.bf16.msra.mxu0 %v3083_v11  ;;  %v4047_v10 = vpack.c.bf16 %v672_v6, %v672_v6  ;;  %v3162_v11 = vld [vmem:[%s4367_s5 + $0x18] ss:$28 sps:$4 sm:$0xff]   ;;  %v3227_v6 = vld [vmem:[%s4367_s5 + $0x4b0] ss:$28 sps:$4 sm:$0xff]  }
 0x1e8   :  { %2172 = vmatprep.subr.bf16.mxu1 %v3088_v12  ;;  %2254 = vmatprep.subr.bf16.mxu0 %v3091_v13  ;;  %v3165_v12 = vld [vmem:[%s4367_s5 + $0x4c] ss:$28 sps:$4 sm:$0xff]  }
 0x1e9   :  { %v3166_v13 = vld [vmem:[%s4367_s5 + $0x210] ss:$28 sps:$4 sm:$0xff]  }
 0x1eb   :  { %2173 = vmatpush1.bf16.msra.mxu1 %v3086_v14  ;;  %2255 = vmatpush1.bf16.msra.mxu0 %v3089_v15  ;;  %v3163_v14 = vld [vmem:[%s4367_s5 + $0x48] ss:$28 sps:$4 sm:$0xff]   ;;  %v3167_v15 = vld [vmem:[%s4367_s5 + $0x50] ss:$28 sps:$4 sm:$0xff]  }
 0x1ec   :  { %2174 = vmatprep.subr.bf16.mxu1 %v3094_v16  ;;  %2256 = vmatprep.subr.bf16.mxu0 %v3097_v17  ;;  %v3170_v16 = vld [vmem:[%s4367_s5 + $0x84] ss:$28 sps:$4 sm:$0xff]  }
 0x1ed   :  { %v3171_v17 = vld [vmem:[%s4367_s5 + $0x248] ss:$28 sps:$4 sm:$0xff]  }
 0x1ef   :  { %2175 = vmatpush1.bf16.msra.mxu1 %v3092_v18  ;;  %2257 = vmatpush1.bf16.msra.mxu0 %v3095_v19  ;;  %v3168_v18 = vld [vmem:[%s4367_s5 + $0x80] ss:$28 sps:$4 sm:$0xff]  }
 0x1f0   :  { %2176 = vmatprep.subr.bf16.mxu1 %v3100_v20  ;;  %2258 = vmatprep.subr.bf16.mxu0 %v3103_v23  ;;  %v3175_v19 = vld [vmem:[%s4367_s5 + $0xbc] ss:$28 sps:$4 sm:$0xff]  }
 0x1f1   :  { %v3176_v20 = vld [vmem:[%s4367_s5 + $0x280] ss:$28 sps:$4 sm:$0xff]   ;;  %v3173_v23 = vld [vmem:[%s4367_s5 + $0xb8] ss:$28 sps:$4 sm:$0xff]  }
 0x1f3   :  { %2177 = vmatpush1.bf16.msra.mxu1 %v3098_v25  ;;  %2259 = vmatpush1.bf16.msra.mxu0 %v3101_v26  ;;  %v3177_v25 = vld [vmem:[%s4367_s5 + $0xc0] ss:$28 sps:$4 sm:$0xff]   ;;  %v3180_v26 = vld [vmem:[%s4367_s5 + $0xf4] ss:$28 sps:$4 sm:$0xff]  }
 0x1f4   :  { %2178 = vmatprep.subr.bf16.mxu1 %v3106_v27  ;;  %2260 = vmatprep.subr.bf16.mxu0 %v3109_v28  ;;  %v3181_v27 = vld [vmem:[%s4367_s5 + $0x2b8] ss:$28 sps:$4 sm:$0xff]   ;;  %v3178_v28 = vld [vmem:[%s4367_s5 + $0xf0] ss:$28 sps:$4 sm:$0xff]  }
 0x1f7   :  { %2179 = vmatpush1.bf16.msra.mxu1 %v3104_v29  ;;  %2261 = vmatpush1.bf16.msra.mxu0 %v3107_v30  ;;  %v3182_v29 = vld [vmem:[%s4367_s5 + $0xf8] ss:$28 sps:$4 sm:$0xff]   ;;  %v3185_v30 = vld [vmem:[%s4367_s5 + $0x12c] ss:$28 sps:$4 sm:$0xff]  }
 0x1f8   :  { %2180 = vmatprep.subr.bf16.mxu1 %v3112_v31  ;;  %2262 = vmatprep.subr.bf16.mxu0 %v3115_v32  ;;  %v3186_v31 = vld [vmem:[%s4367_s5 + $0x2f0] ss:$28 sps:$4 sm:$0xff]   ;;  %v3183_v32 = vld [vmem:[%s4367_s5 + $0x128] ss:$28 sps:$4 sm:$0xff]  }
 0x1fb   :  { %2181 = vmatpush1.bf16.msra.mxu1 %v3110_v33  ;;  %2263 = vmatpush1.bf16.msra.mxu0 %v3113_v34  ;;  %v3187_v33 = vld [vmem:[%s4367_s5 + $0x130] ss:$28 sps:$4 sm:$0xff]   ;;  %v3190_v34 = vld [vmem:[%s4367_s5 + $0x164] ss:$28 sps:$4 sm:$0xff]  }
 0x1fc   :  { %2182 = vmatprep.subr.bf16.mxu1 %v3118_v35  ;;  %2264 = vmatprep.subr.bf16.mxu0 %v3121_v36  ;;  %v3191_v35 = vld [vmem:[%s4367_s5 + $0x328] ss:$28 sps:$4 sm:$0xff]   ;;  %v3188_v36 = vld [vmem:[%s4367_s5 + $0x160] ss:$28 sps:$4 sm:$0xff]  }
 0x1ff   :  { %2183 = vmatpush1.bf16.msra.mxu1 %v3116_v37  ;;  %2265 = vmatpush1.bf16.msra.mxu0 %v3119_v38  ;;  %v3192_v37 = vld [vmem:[%s4367_s5 + $0x168] ss:$28 sps:$4 sm:$0xff]   ;;  %v3195_v38 = vld [vmem:[%s4367_s5 + $0x19c] ss:$28 sps:$4 sm:$0xff]  }
 0x200   :  { %2184 = vmatprep.subr.bf16.mxu1 %v3124_v39  ;;  %2266 = vmatprep.subr.bf16.mxu0 %v3127_v42  ;;  %v3196_v39 = vld [vmem:[%s4367_s5 + $0x360] ss:$28 sps:$4 sm:$0xff]   ;;  %v3193_v42 = vld [vmem:[%s4367_s5 + $0x198] ss:$28 sps:$4 sm:$0xff]  }
 0x203   :  { %2185 = vmatpush1.bf16.msra.mxu1 %v3122_v43  ;;  %2267 = vmatpush1.bf16.msra.mxu0 %v3125_v44  ;;  %v3197_v43 = vld [vmem:[%s4367_s5 + $0x1a0] ss:$28 sps:$4 sm:$0xff]   ;;  %v3200_v44 = vld [vmem:[%s4367_s5 + $0x1d4] ss:$28 sps:$4 sm:$0xff]  }
 0x204   :  { %2186 = vmatprep.subr.bf16.mxu1 %v3130_v45  ;;  %2268 = vmatprep.subr.bf16.mxu0 %v3133_v47  ;;  %v3201_v45 = vld [vmem:[%s4367_s5 + $0x558] ss:$28 sps:$4 sm:$0xff]   ;;  %v3198_v47 = vld [vmem:[%s4367_s5 + $0x1d0] ss:$28 sps:$4 sm:$0xff]  }
 0x207   :  { %2187 = vmatpush1.bf16.msra.mxu1 %v3128_v48  ;;  %2269 = vmatpush1.bf16.msra.mxu0 %v3131_v49  ;;  %v3202_v48 = vld [vmem:[%s4367_s5 + $0x398] ss:$28 sps:$4 sm:$0xff]   ;;  %v3205_v49 = vld [vmem:[%s4367_s5 + $0x20c] ss:$28 sps:$4 sm:$0xff]  }
 0x208   :  { %2188 = vmatprep.subr.bf16.mxu1 %v3136_v50  ;;  %2270 = vmatprep.subr.bf16.mxu0 %v3139_v51  ;;  %v3206_v50 = vld [vmem:[%s4367_s5 + $0x590] ss:$28 sps:$4 sm:$0xff]   ;;  %v3203_v51 = vld [vmem:[%s4367_s5 + $0x208] ss:$28 sps:$4 sm:$0xff]  }
 0x20b   :  { %2189 = vmatpush1.bf16.msra.mxu1 %v3134_v52  ;;  %2271 = vmatpush1.bf16.msra.mxu0 %v3137_v53  ;;  %v3207_v52 = vld [vmem:[%s4367_s5 + $0x3d0] ss:$28 sps:$4 sm:$0xff]   ;;  %v3210_v53 = vld [vmem:[%s4367_s5 + $0x244] ss:$28 sps:$4 sm:$0xff]  }
 0x20c   :  { %2190 = vmatprep.subr.bf16.mxu1 %v3142_v55  ;;  %2272 = vmatprep.subr.bf16.mxu0 %v3145_v56  ;;  %v3211_v55 = vld [vmem:[%s4367_s5 + $0x5c8] ss:$28 sps:$4 sm:$0xff]   ;;  %v3208_v56 = vld [vmem:[%s4367_s5 + $0x240] ss:$28 sps:$4 sm:$0xff]  }
 0x20f   :  { %2191 = vmatpush1.bf16.msra.mxu1 %v3140_v57  ;;  %2273 = vmatpush1.bf16.msra.mxu0 %v3143_v58  ;;  %v3212_v57 = vld [vmem:[%s4367_s5 + $0x408] ss:$28 sps:$4 sm:$0xff]   ;;  %v3215_v58 = vld [vmem:[%s4367_s5 + $0x27c] ss:$28 sps:$4 sm:$0xff]  }
 0x210   :  { %2192 = vmatprep.subr.bf16.mxu1 %v3148_v61  ;;  %2274 = vmatprep.subr.bf16.mxu0 %v3151_v63  ;;  %v3213_v61 = vld [vmem:[%s4367_s5 + $0x278] ss:$28 sps:$4 sm:$0xff]   ;;  %v3217_v63 = vld [vmem:[%s4367_s5 + $0x440] ss:$28 sps:$4 sm:$0xff]  }
 0x213   :  { %2193 = vmatpush1.bf16.msra.mxu1 %v3146_v0  ;;  %2275 = vmatpush1.bf16.msra.mxu0 %v3149_v40  ;;  %v3220_v0 = vld [vmem:[%s4367_s5 + $0x2b4] ss:$28 sps:$4 sm:$0xff]  }
 0x214   :  { %2194 = vmatprep.subr.bf16.mxu1 %v3154_v3  ;;  %2276 = vmatprep.subr.bf16.mxu0 %v3157_v4  ;;  %v3221_v40 = vld [vmem:[%s4367_s5 + $0x638] ss:$28 sps:$4 sm:$0xff]   ;;  %v3225_v4 = vld [vmem:[%s4367_s5 + $0x2ec] ss:$28 sps:$4 sm:$0xff]  }
 0x215   :  { %v3222_v3 = vld [vmem:[%s4367_s5 + $0x478] ss:$28 sps:$4 sm:$0xff]  }
 0x217   :  { %2195 = vmatpush1.bf16.msra.mxu1 %v3152_v5  ;;  %2277 = vmatpush1.bf16.msra.mxu0 %v3155_v46  ;;  %v3226_v5 = vld [vmem:[%s4367_s5 + $0x670] ss:$28 sps:$4 sm:$0xff]   ;;  %v3223_v46 = vld [vmem:[%s4367_s5 + $0x2e8] ss:$28 sps:$4 sm:$0xff]  }
 0x218   :  { %2287 = vmatprep.subr.bf16.mxu1 %v3160_v7  ;;  %2782 = vmatprep.subr.bf16.mxu0 %v3161_v8  ;;  %v3230_v7 = vld [vmem:[%s4367_s5 + $0x324] ss:$28 sps:$4 sm:$0xff]  }
 0x219   :  { %v3231_v8 = vld [vmem:[%s4367_s5 + $0x6a8] ss:$28 sps:$4 sm:$0xff]  }
 0x21a   :  { %2197 = vmatmul.mubr.bf16.vlgmr.msra.gmra.mrb[4].mxu1 %v4047_v10  ;;  %2279 = vmatmul.mubr.bf16.vlgmr.msra.gmra.mrb[8].mxu0 %v4047_v10 }
 0x21b   :  { %2288 = vmatpush1.bf16.msra.mxu1 %v3158_v9  ;;  %2319 = vmatprep.mubr.bf16.mxu1 %v3835_v59  ;;  %v3228_v9 = vld [vmem:[%s4367_s5 + $0x320] ss:$28 sps:$4 sm:$0xff]  }
 0x21c   :  { %2783 = vmatpush3.bf16.msra.mxu0 %v3162_v11  ;;  %2401 = vmatprep.mubr.bf16.mxu0 %v3835_v59  ;;  %v3172_v59 = vld [vmem:[%s4367_s5 + $0x88] ss:$28 sps:$4 sm:$0xff]  }
 0x21d   :  { %2289 = vmatprep.subr.bf16.mxu1 %v3165_v12  ;;  %2784 = vmatprep.subr.bf16.mxu0 %v3166_v13  ;;  %v3232_v11 = vld [vmem:[%s4367_s5 + $0x4e8] ss:$28 sps:$4 sm:$0xff]   ;;  %v3235_v12 = vld [vmem:[%s4367_s5 + $0x35c] ss:$28 sps:$4 sm:$0xff]  }
 0x21e   :  { %v3236_v13 = vld [vmem:[%s4367_s5 + $0x6e0] ss:$28 sps:$4 sm:$0xff]  }
 0x21f   :  { %2290 = vmatpush1.bf16.msra.mxu1 %v3163_v14  ;;  %v3233_v14 = vld [vmem:[%s4367_s5 + $0x358] ss:$28 sps:$4 sm:$0xff]  }
 0x220   :  { %2785 = vmatpush3.bf16.msra.mxu0 %v3167_v15  ;;  %2291 = vmatprep.subr.bf16.mxu1 %v3170_v16  ;;  %v3237_v15 = vld [vmem:[%s4367_s5 + $0x520] ss:$28 sps:$4 sm:$0xff]   ;;  %v3240_v16 = vld [vmem:[%s4367_s5 + $0x394] ss:$28 sps:$4 sm:$0xff]  }
 0x221   :  { %2786 = vmatprep.subr.bf16.mxu0 %v3171_v17  ;;  %v3238_v17 = vld [vmem:[%s4367_s5 + $0x390] ss:$28 sps:$4 sm:$0xff]  }
 0x223   :  { %2292 = vmatpush1.bf16.msra.mxu1 %v3168_v18  ;;  %v3243_v18 = vld [vmem:[%s4367_s5 + $0x3cc] ss:$28 sps:$4 sm:$0xff]  }
 0x224   :  { %2787 = vmatpush3.bf16.msra.mxu0 %v3172_v59  ;;  %2293 = vmatprep.subr.bf16.mxu1 %v3175_v19  ;;  %v3241_v59 = vld [vmem:[%s4367_s5 + $0x3c8] ss:$28 sps:$4 sm:$0xff]  }
 0x225   :  { %2788 = vmatprep.subr.bf16.mxu0 %v3176_v20  ;;  %v3246_v19 = vld [vmem:[%s4367_s5 + $0x404] ss:$28 sps:$4 sm:$0xff]  }
 0x226   :  { %v3244_v20 = vld [vmem:[%s4367_s5 + $0x400] ss:$28 sps:$4 sm:$0xff]  }
 0x227   :  { %2294 = vmatpush1.bf16.msra.mxu1 %v3173_v23  ;;  %v3252_v23 = vld [vmem:[%s4367_s5 + $0x474] ss:$28 sps:$4 sm:$0xff]  }
 0x228   :  { %2789 = vmatpush3.bf16.msra.mxu0 %v3177_v25  ;;  %2295 = vmatprep.subr.bf16.mxu1 %v3180_v26  ;;  %v3250_v25 = vld [vmem:[%s4367_s5 + $0x470] ss:$28 sps:$4 sm:$0xff]  }
 0x229   :  { %2790 = vmatprep.subr.bf16.mxu0 %v3181_v27  ;;  %v3255_v26 = vld [vmem:[%s4367_s5 + $0x4ac] ss:$28 sps:$4 sm:$0xff]  }
 0x22a   :  { %v3253_v27 = vld [vmem:[%s4367_s5 + $0x4a8] ss:$28 sps:$4 sm:$0xff]  }
 0x22b   :  { %2296 = vmatpush1.bf16.msra.mxu1 %v3178_v28  ;;  %v3258_v28 = vld [vmem:[%s4367_s5 + $0x4e4] ss:$28 sps:$4 sm:$0xff]  }
 0x22c   :  { %2791 = vmatpush3.bf16.msra.mxu0 %v3182_v29  ;;  %2297 = vmatprep.subr.bf16.mxu1 %v3185_v30  ;;  %v3256_v29 = vld [vmem:[%s4367_s5 + $0x4e0] ss:$28 sps:$4 sm:$0xff]  }
 0x22d   :  { %2792 = vmatprep.subr.bf16.mxu0 %v3186_v31  ;;  %v3261_v30 = vld [vmem:[%s4367_s5 + $0x51c] ss:$28 sps:$4 sm:$0xff]  }
 0x22e   :  { %v3259_v31 = vld [vmem:[%s4367_s5 + $0x518] ss:$28 sps:$4 sm:$0xff]  }
 0x22f   :  { %2298 = vmatpush1.bf16.msra.mxu1 %v3183_v32  ;;  %v3264_v32 = vld [vmem:[%s4367_s5 + $0x554] ss:$28 sps:$4 sm:$0xff]  }
 0x230   :  { %2793 = vmatpush3.bf16.msra.mxu0 %v3187_v33  ;;  %2299 = vmatprep.subr.bf16.mxu1 %v3190_v34  ;;  %v3262_v33 = vld [vmem:[%s4367_s5 + $0x550] ss:$28 sps:$4 sm:$0xff]  }
 0x231   :  { %2794 = vmatprep.subr.bf16.mxu0 %v3191_v35  ;;  %v3267_v34 = vld [vmem:[%s4367_s5 + $0x58c] ss:$28 sps:$4 sm:$0xff]  }
 0x232   :  { %v3265_v35 = vld [vmem:[%s4367_s5 + $0x588] ss:$28 sps:$4 sm:$0xff]  }
 0x233   :  { %2300 = vmatpush1.bf16.msra.mxu1 %v3188_v36  ;;  %v3270_v36 = vld [vmem:[%s4367_s5 + $0x5c4] ss:$28 sps:$4 sm:$0xff]  }
 0x234   :  { %2795 = vmatpush3.bf16.msra.mxu0 %v3192_v37  ;;  %2301 = vmatprep.subr.bf16.mxu1 %v3195_v38  ;;  %v3268_v37 = vld [vmem:[%s4367_s5 + $0x5c0] ss:$28 sps:$4 sm:$0xff]  }
 0x235   :  { %2796 = vmatprep.subr.bf16.mxu0 %v3196_v39  ;;  %v3273_v38 = vld [vmem:[%s4367_s5 + $0x5fc] ss:$28 sps:$4 sm:$0xff]  }
 0x236   :  { %v3271_v39 = vld [vmem:[%s4367_s5 + $0x5f8] ss:$28 sps:$4 sm:$0xff]  }
 0x237   :  { %2302 = vmatpush1.bf16.msra.mxu1 %v3193_v42  ;;  %v3276_v42 = vld [vmem:[%s4367_s5 + $0x634] ss:$28 sps:$4 sm:$0xff]  }
 0x238   :  { %2797 = vmatpush3.bf16.msra.mxu0 %v3197_v43  ;;  %2303 = vmatprep.subr.bf16.mxu1 %v3200_v44  ;;  %v3274_v43 = vld [vmem:[%s4367_s5 + $0x630] ss:$28 sps:$4 sm:$0xff]  }
 0x239   :  { %2804 = vmatprep.subr.bf16.mxu0 %v3201_v45  ;;  %v3279_v44 = vld [vmem:[%s4367_s5 + $0x66c] ss:$28 sps:$4 sm:$0xff]  }
 0x23a   :  { %v3277_v45 = vld [vmem:[%s4367_s5 + $0x668] ss:$28 sps:$4 sm:$0xff]  }
 0x23b   :  { %2402 = vmatmul.mubr.bf16.vlgmr.msra.gmra.mrb[12].mxu0 %v3843_v62  ;;  %2304 = vmatpush1.bf16.msra.mxu1 %v3198_v47  ;;  %v3282_v47 = vld [vmem:[%s4367_s5 + $0x6a4] ss:$28 sps:$4 sm:$0xff]  }
 0x23c   :  { %2805 = vmatpush3.bf16.msra.mxu0 %v3202_v48  ;;  %2441 = vmatprep.mubr.bf16.mxu0 %v3853_v1  ;;  %v3280_v48 = vld [vmem:[%s4367_s5 + $0x6a0] ss:$28 sps:$4 sm:$0xff]  }
 0x23d   :  { %2305 = vmatprep.subr.bf16.mxu1 %v3205_v49  ;;  %2806 = vmatprep.subr.bf16.mxu0 %v3206_v50  ;;  %v3285_v49 = vld [vmem:[%s4367_s5 + $0x6dc] ss:$28 sps:$4 sm:$0xff]  }
 0x23e   :  { %v3283_v50 = vld [vmem:[%s4367_s5 + $0x6d8] ss:$28 sps:$4 sm:$0xff]  }
 0x23f   :  { %2306 = vmatpush1.bf16.msra.mxu1 %v3203_v51  ;;  %v934_v51 = vld [vmem:[%s4368_s6] sm:$0x7f] }
 0x240   :  { %2807 = vmatpush3.bf16.msra.mxu0 %v3207_v52  ;;  %2307 = vmatprep.subr.bf16.mxu1 %v3210_v53  ;;  %v939_v52 = vrot.slane %v934_v51, %v3618_v22  ;;  %v947_v53 = vrot.slane %v934_v51, %v258_v54 }
 0x241   :  { %2808 = vmatprep.subr.bf16.mxu0 %v3211_v55  ;;  %v943_v55 = vrot.slane %v934_v51, %v3624_v24 }
 0x243   :  { %2308 = vmatpush1.bf16.msra.mxu1 %v3208_v56  ;;  %v951_v56 = vrot.slane %v934_v51, %v262_v41 }
 0x244   :  { %2809 = vmatpush3.bf16.msra.mxu0 %v3212_v57  ;;  %2309 = vmatprep.subr.bf16.mxu1 %v3215_v58 }
 0x245   :  { %2810 = vmatprep.subr.bf16.mxu0 %v3216_v60 }
 0x247   :  { %2310 = vmatpush1.bf16.msra.mxu1 %v3213_v61 }
 0x248   :  { %2811 = vmatpush3.bf16.msra.mxu0 %v3217_v63  ;;  %2311 = vmatprep.subr.bf16.mxu1 %v3220_v0 }
 0x249   :  { %2812 = vmatprep.subr.bf16.mxu0 %v3221_v40 }
 0x24b   :  { %2312 = vmatpush1.bf16.msra.mxu1 %v3218_v2 }
 0x24c   :  { %2813 = vmatpush3.bf16.msra.mxu0 %v3222_v3  ;;  %2313 = vmatprep.subr.bf16.mxu1 %v3225_v4 }
 0x24d   :  { %2814 = vmatprep.subr.bf16.mxu0 %v3226_v5 }
 0x24f   :  { %2314 = vmatpush1.bf16.msra.mxu1 %v3223_v46 }
 0x250   :  { %2815 = vmatpush3.bf16.msra.mxu0 %v3227_v6  ;;  %2315 = vmatprep.subr.bf16.mxu1 %v3230_v7 }
 0x251   :  { %2816 = vmatprep.subr.bf16.mxu0 %v3231_v8 }
 0x253   :  { %2316 = vmatpush1.bf16.msra.mxu1 %v3228_v9 }
 0x254   :  { %2817 = vmatpush3.bf16.msra.mxu0 %v3232_v11  ;;  %2317 = vmatprep.subr.bf16.mxu1 %v3235_v12  ;;  %v962_v11 = vsub.s32 6, %v3615_v21 }
 0x255   :  { %2818 = vmatprep.subr.bf16.mxu0 %v3236_v13 }
 0x256   :  { %v963_v12 = vrot.slane %v934_v51, %v962_v11 }
 0x257   :  { %2318 = vmatpush1.bf16.msra.mxu1 %v3233_v14 }
 0x258   :  { %2819 = vmatpush3.bf16.msra.mxu0 %v3237_v15  ;;  %2328 = vmatprep.subr.bf16.mxu1 %v3240_v16 }
 0x25a   :  { %2320 = vmatmul.mubr.bf16.vlgmr.msra.gmra.mrb[8].mxu1 %v3843_v62  ;;  %v3249_v62 = vld [vmem:[%s4367_s5 + $0x43c] ss:$28 sps:$4 sm:$0xff]  }
 0x25b   :  { %2442 = vmatmul.mubr.bf16.vlgmr.msra.gmra.mrb[16].mxu0 %v4047_v10  ;;  %2329 = vmatpush1.bf16.msra.mxu1 %v3238_v17 }
 0x25c   :  { %2360 = vmatprep.mubr.bf16.mxu1 %v3853_v1  ;;  %2330 = vmatprep.subr.bf16.mxu1 %v3243_v18  ;;  %v3247_v1 = vld [vmem:[%s4367_s5 + $0x438] ss:$28 sps:$4 sm:$0xff]   ;;  %s3325_s5 = smov [#allocation2]  }
 0x25d   :  { %s2470_s6 = sshll.u32 %s3325_s5, 4  ;;  %s2471_s6 = int_to_ptr.vmem [resolvable:$true] %s2470_s6 }
 0x25e   :  { %s3300_s23 = scalar_lea.vmem %s2471_s6, 896  ;;  %p3305_p1 = scmp.lt.s32.totalorder %s2471_s6, %s2471_s6 }
 0x25f   :  { %2331 = vmatpush1.bf16.msra.mxu1 %v3241_v59  ;;  %p3301_p0 = scmp.ne.s32.totalorder %s2471_s6, %s3300_s23  ;;  %p3306_p2 = scmp.lt.s32.totalorder %s3300_s23, %s3300_s23 }
 0x260   :  { %2332 = vmatprep.subr.bf16.mxu1 %v3246_v19 }
 0x261   :  { %p3307_p3 = por %p3306_p2, %p3305_p1 }
 0x263   :  { %2333 = vmatpush1.bf16.msra.mxu1 %v3244_v20  ;;  %v954_v20 = vsub.s32 4, %v3615_v21  ;;  %p3308_p4 = pnand %p3307_p3, %p3301_p0 }
 0x264   :  { %2334 = vmatprep.subr.bf16.mxu1 %v3249_v62  ;;  %v958_v62 = vsub.s32 5, %v3615_v21 }
 0x267   :  { %2335 = vmatpush1.bf16.msra.mxu1 %v3247_v1  ;;  %v955_v1 = vrot.slane %v934_v51, %v954_v20 }
 0x268   :  { %2336 = vmatprep.subr.bf16.mxu1 %v3252_v23  ;;  %v959_v23 = vrot.slane %v934_v51, %v958_v62 }
 0x26b   :  { %2337 = vmatpush1.bf16.msra.mxu1 %v3250_v25 }
 0x26c   :  { %2338 = vmatprep.subr.bf16.mxu1 %v3255_v26 }
 0x26f   :  { %2339 = vmatpush1.bf16.msra.mxu1 %v3253_v27 }
 0x270   :  { %2340 = vmatprep.subr.bf16.mxu1 %v3258_v28 }
 0x273   :  { %2341 = vmatpush1.bf16.msra.mxu1 %v3256_v29 }
 0x274   :  { %2342 = vmatprep.subr.bf16.mxu1 %v3261_v30 }
 0x277   :  { %2343 = vmatpush1.bf16.msra.mxu1 %v3259_v31 }
 0x278   :  { %2344 = vmatprep.subr.bf16.mxu1 %v3264_v32 }
 0x27b   :  { %2345 = vmatpush1.bf16.msra.mxu1 %v3262_v33 }
 0x27c   :  { %2346 = vmatprep.subr.bf16.mxu1 %v3267_v34 }
 0x27f   :  { %2347 = vmatpush1.bf16.msra.mxu1 %v3265_v35 }
 0x280   :  { %2348 = vmatprep.subr.bf16.mxu1 %v3270_v36 }
 0x283   :  { %2349 = vmatpush1.bf16.msra.mxu1 %v3268_v37 }
 0x284   :  { %2350 = vmatprep.subr.bf16.mxu1 %v3273_v38 }
 0x287   :  { %2351 = vmatpush1.bf16.msra.mxu1 %v3271_v39 }
 0x288   :  { %2352 = vmatprep.subr.bf16.mxu1 %v3276_v42 }
 0x28b   :  { %2353 = vmatpush1.bf16.msra.mxu1 %v3274_v43 }
 0x28c   :  { %2354 = vmatprep.subr.bf16.mxu1 %v3279_v44 }
 0x28f   :  { %2355 = vmatpush1.bf16.msra.mxu1 %v3277_v45 }
 0x290   :  { %2356 = vmatprep.subr.bf16.mxu1 %v3282_v47 }
 0x293   :  { %2357 = vmatpush1.bf16.msra.mxu1 %v3280_v48 }
 0x294   :  { %2358 = vmatprep.subr.bf16.mxu1 %v3285_v49 }
 0x297   :  { %2359 = vmatpush1.bf16.msra.mxu1 %v3283_v50 }
 0x29a   :  { %2361 = vmatmul.mubr.bf16.vlgmr.msra.gmra.mrb[8].mxu1 %v4047_v10 }
 0x2ed   :  { %v2198_v57 = vpop.f32.mrb[4].mxu1  ;;  %v2280_v58 = vpop.f32.mrb[8].mxu0 }
 0x2ee   :  { %v2826_v60 = vadd.f32 %v2198_v57, %v939_v52  ;;  %v2828_v61 = vadd.f32 %v2280_v58, %v947_v53  ;;  %v2200_v63 = vpop.f32.mrb[5].mxu1  ;;  %v2282_v10 = vpop.f32.mrb[9].mxu0 }
 0x2ef   :  { %v2827_v0 = vadd.f32 %v2200_v63, %v943_v55  ;;  %v2829_v40 = vadd.f32 %v2282_v10, %v951_v56  ;;  %v2202_v2 = vpop.f32.mrb[6].mxu1  ;;  %v2284_v3 = vpop.f32.mrb[10].mxu0 }
 0x2f0   :  { %3286 = vtanh.f32 %v2826_v60  ;;  %v2203_v22 = vpop.f32.mrb[7].mxu1  ;;  %v2285_v4 = vpop.f32.mrb[11].mxu0 }
 0x2f1   :  { %3288 = vtanh.f32 %v2828_v61 }
 0x2f2   :  { %3290 = vtanh.f32 %v2827_v0 }
 0x2f3   :  { %3292 = vtanh.f32 %v2829_v40 }
 0x2fa   :  { %v3287_v24 = vpop.eup %3286 }
 0x2fb   :  { %v3289_v54 = vpop.eup %3288  ;;  %2456 = vst [vmem:[#allocation2] sm:$0xff] %v3287_v24 }
 0x2fc   :  { %v3291_v41 = vpop.eup %3290  ;;  %2458 = vst [vmem:[#allocation2 + $0x10] sm:$0xff] %v3289_v54 }
 0x2fd   :  { %v3293_v5 = vpop.eup %3292  ;;  %2457 = vst [vmem:[#allocation2 + $0x8] sm:$0xff] %v3291_v41 }
 0x2fe   :  { %2459 = vst [vmem:[#allocation2 + $0x18] sm:$0xff] %v3293_v5 }
 0x30e   :  { %v2798_v46 = vpop.f32.mrb[12].mxu0 }
 0x30f   :  { %v2799_v6 = vpop.f32.mrb[13].mxu0 }
 0x310   :  { %v2800_v7 = vadd.f32 %v2799_v6, %v2798_v46  ;;  %v2801_v8 = vpop.f32.mrb[14].mxu0 }
 0x311   :  { %v2802_v9 = vpop.f32.mrb[15].mxu0 }
 0x312   :  { %v2404_v15 = vadd.f32 %v2800_v7, %v963_v12 }
 0x32e   :  { %v2820_v13 = vpop.f32.mrb[16].mxu0 }
 0x32f   :  { %v2821_v14 = vpop.f32.mrb[17].mxu0 }
 0x330   :  { %v2822_v16 = vadd.f32 %v2821_v14, %v2820_v13  ;;  %v2823_v17 = vpop.f32.mrb[18].mxu0 }
 0x331   :  { %v2824_v18 = vpop.f32.mrb[19].mxu0 }
 0x332   :  { %v2444_v59 = vadd.f32 %v2822_v16, %v2404_v15 }
 0x334   :  { %3294 = vtanh.f32 %v2444_v59 }
 0x33e   :  { %v3295_v19 = vpop.eup %3294 }
 0x33f   :  { %2463 = vst.msk [vmem:[#allocation2 + $0x30] sm:$0xff] %vm2462_vm0, %v3295_v19 }
 0x36d   :  { %v2362_v25 = vpop.f32.mrb[8].mxu1 }
 0x36e   :  { %v2830_v26 = vadd.f32 %v2362_v25, %v955_v1  ;;  %v2364_v27 = vpop.f32.mrb[9].mxu1 }
 0x36f   :  { %v2831_v28 = vadd.f32 %v2364_v27, %v959_v23  ;;  %v2366_v29 = vpop.f32.mrb[10].mxu1 }
 0x370   :  { %3296 = vtanh.f32 %v2830_v26  ;;  %v2367_v30 = vpop.f32.mrb[11].mxu1 }
 0x371   :  { %3298 = vtanh.f32 %v2831_v28 }
 0x37a   :  { %v3297_v31 = vpop.eup %3296 }
 0x37b   :  { %v3299_v32 = vpop.eup %3298  ;;  %2460 = vst [vmem:[#allocation2 + $0x20] sm:$0xff] %v3297_v31 }
 0x37c   :  { %2461 = vst [vmem:[#allocation2 + $0x28] sm:$0xff] %v3299_v32 }
 0x37d   :  { %3311 = shalt.err (!%p3308_p4)
}
 0x37e   :  { %s3312_s26 = scalar_lea.hbm %s4369_s7, 896 }
 0x37f   :  { %p3313_p5 = scmp.ne.s32.totalorder %s4369_s7, %s3312_s26  ;;  %p3316_p6 = scmp.lt.u32.totalorder %s3312_s26, %s4369_s7 }
 0x381   :  { %p3318_p7 = pnand %p3316_p6, %p3313_p5 }
 0x383   :  { %3321 = shalt.err (!%p3318_p7)
}
 0x384   :  { %2473 = dma.vmem_to_hbm [thread:$0]  %s2471_s6, 896, %s4369_s7, [#allocation3]  }
 0x385   :  { %3322 = dma.done.wait [#allocation3], 896  }
 0x386   :  { %3323 = vsyncadd [#allocation3], 4294966400 }
 0x387   :  { %2477 = vsyncpa [#allocation3], 1 }

</bundles_post_ra>
